<compile_context>
chip_gen: v7x
topology: tpu7x:2x2x1
jax: 0.10.0
libtpu: 0.0.40
codegen_flags: <defaults>
</compile_context>

<pallas_src>
import math

import jax
import jax.numpy as jnp
from jax import lax
from jax.experimental import pallas as pl
from jax.experimental.pallas import tpu as pltpu

# ---------------- module hyper-parameters ----------------
IN_FEATURES = 16
OUT_FEATURES = 32
GRID_SIZE = 5
SPLINE_ORDER = 3
GRID_RANGE = (-1.0, 1.0)
NUM_COEF = GRID_SIZE + SPLINE_ORDER              # 8
GRID_PTS = GRID_SIZE + 2 * SPLINE_ORDER + 1      # 12
K_TOTAL = IN_FEATURES * (1 + NUM_COEF)           # 144 (fused matmul K)
CHUNK = 128                                      # lane chunk processed per loop step


def _cdiv(a, b):
    return -(-a // b)


# ---------------- Pallas kernel ----------------
def kan_linear_kernel(x_ref, grid_ref, inv_ref, w_ref, out_ref, act_ref):
    # x_ref:    (cpt, IN, CHUNK)            batch chunks on leading axis, batch on lanes
    # grid_ref: (IN, GRID_PTS)              knot grid (VMEM resident)
    # inv_ref:  (ORDER, IN, GRID_PTS-1)     precomputed 1/(g[:,j+k]-g[:,j]) (resident)
    # w_ref:    (OUT, K_TOTAL)              fused [base_weight | spline coef-major]
    # out_ref:  (cpt, OUT, CHUNK)
    # act_ref:  (K_TOTAL, CHUNK)            VMEM scratch: fused activation, one chunk
    g = grid_ref[...]                                    # (IN, GRID_PTS)
    inv = inv_ref[...]                                   # (ORDER, IN, GRID_PTS-1)
    n_chunks = x_ref.shape[0]                            # static

    def chunk_body(c, carry):
        x = x_ref[c]                                     # (IN, CHUNK)

        # base branch: SiLU (sigmoid on the EUP) written straight into scratch
        act_ref[0:IN_FEATURES, :] = x * jax.nn.sigmoid(x)

        # level-0 indicators: difference of step functions (one compare per knot)
        ge = [(x >= g[:, j:j + 1]).astype(jnp.float32) for j in range(GRID_PTS)]
        b = [ge[j] - ge[j + 1] for j in range(GRID_PTS - 1)]   # 11 slabs of (IN, CHUNK)

        # Cox-de Boor recursion, shared-omega form (unrolled at trace time)
        for k in range(1, SPLINE_ORDER + 1):
            n_new = len(b) - 1
            # p_j = omega_j * b_j, reused between neighbouring output slabs
            p_prev = ((x - g[:, 0:1]) * inv[k - 1, :, 0:1]) * b[0]
            new_b = []
            for j in range(n_new):
                p_next = ((x - g[:, j + 1:j + 2]) * inv[k - 1, :, j + 1:j + 2]) * b[j + 1]
                val = b[j + 1] + p_prev - p_next
                p_prev = p_next
                if k == SPLINE_ORDER:
                    # final-order slab -> straight into the fused activation scratch
                    lo = IN_FEATURES * (1 + j)
                    act_ref[lo:lo + IN_FEATURES, :] = val
                else:
                    new_b.append(val)
            b = new_b

        # one fused MXU matmul per chunk: base + spline branches together
        out_ref[c] = jnp.dot(w_ref[...], act_ref[...],
                             preferred_element_type=jnp.float32).astype(out_ref.dtype)
        return carry

    # loop body (~600 vreg-ops) dwarfs per-iteration loop overhead; unroll sweepable.
    lax.fori_loop(0, n_chunks, chunk_body, 0)


# ---------------- wrapper ----------------
def kan_linear_forward(x, knot_grid, base_weight, spline_weight, spline_scaler,
                       *, block_b=4096):
    """x: (..., IN_FEATURES). Returns (..., OUT_FEATURES)."""
    orig_shape = x.shape
    x2d = x.reshape(-1, IN_FEATURES).astype(jnp.float32)
    batch = x2d.shape[0]

    # ---- tile selection: bounded padding waste + >=2 grid steps when possible ----
    n_chunks = _cdiv(batch, CHUNK)
    cap = max(1, block_b // CHUNK)                       # max chunks per grid step
    nb = max(2, _cdiv(n_chunks, cap)) if n_chunks >= 2 else 1
    cpt = _cdiv(n_chunks, nb)                            # chunks per grid step (<= cap)
    padded_chunks = nb * cpt
    padded = padded_chunks * CHUNK

    # glue: one layout pass -> (padded_chunks, IN, CHUNK), batch on lanes
    # TODO(synk): could fold this transpose into the kernel (natural (CHUNK, IN)
    # blocks + in-kernel XLU transpose) once small-minor-dim transposes are robust.
    x_pad = jnp.pad(x2d, ((0, padded - batch), (0, 0)))
    x3 = jnp.transpose(x_pad.reshape(padded_chunks, CHUNK, IN_FEATURES), (0, 2, 1))

    # glue: fused weight [base_weight | scaled spline, coef-major] -> (OUT, 144)
    scaled = spline_weight * spline_scaler[..., None]                     # (OUT, IN, COEF)
    spline_flat = jnp.transpose(scaled, (0, 2, 1)).reshape(
        OUT_FEATURES, NUM_COEF * IN_FEATURES)                             # (OUT, 128)
    w_cat = jnp.concatenate(
        [base_weight.astype(jnp.float32), spline_flat.astype(jnp.float32)], axis=1)

    # glue: precompute Cox-de Boor denominator reciprocals (batch independent)
    inv_den = jnp.zeros((SPLINE_ORDER, IN_FEATURES, GRID_PTS - 1), jnp.float32)
    for k in range(1, SPLINE_ORDER + 1):
        inv_k = 1.0 / (knot_grid[:, k:] - knot_grid[:, :-k])              # (IN, GRID_PTS-k)
        inv_den = inv_den.at[k - 1, :, :GRID_PTS - k].set(inv_k)

    out3 = pl.pallas_call(
        kan_linear_kernel,
        out_shape=jax.ShapeDtypeStruct((padded_chunks, OUT_FEATURES, CHUNK), jnp.float32),
        grid=(nb,),
        in_specs=[
            pl.BlockSpec((cpt, IN_FEATURES, CHUNK), lambda i: (i, 0, 0)),        # x chunks
            pl.BlockSpec((IN_FEATURES, GRID_PTS), lambda i: (0, 0)),             # knot grid
            pl.BlockSpec((SPLINE_ORDER, IN_FEATURES, GRID_PTS - 1),
                         lambda i: (0, 0, 0)),                                   # reciprocals
            pl.BlockSpec((OUT_FEATURES, K_TOTAL), lambda i: (0, 0)),             # fused W
        ],
        out_specs=pl.BlockSpec((cpt, OUT_FEATURES, CHUNK), lambda i: (i, 0, 0)),
        scratch_shapes=[pltpu.VMEM((K_TOTAL, CHUNK), jnp.float32)],
        compiler_params=pltpu.CompilerParams(dimension_semantics=("parallel",)),
    )(x3, knot_grid.astype(jnp.float32), inv_den, w_cat)

    # glue: back to (batch, OUT_FEATURES)
    out = jnp.transpose(out3, (0, 2, 1)).reshape(padded, OUT_FEATURES)[:batch]
    return out.reshape(*orig_shape[:-1], OUT_FEATURES)


# ---------------- pure-JAX reference (mirrors the PyTorch forward) ----------------
def kan_linear_reference(x, knot_grid, base_weight, spline_weight, spline_scaler):
    orig_shape = x.shape
    x2d = x.reshape(-1, IN_FEATURES).astype(jnp.float32)
    xe = x2d[:, :, None]
    bases = jnp.logical_and(xe >= knot_grid[:, :-1], xe < knot_grid[:, 1:]).astype(jnp.float32)
    for k in range(1, SPLINE_ORDER + 1):
        left = (xe - knot_grid[:, : -(k + 1)]) / (knot_grid[:, k:-1] - knot_grid[:, : -(k + 1)])
        right = (knot_grid[:, k + 1:] - xe) / (knot_grid[:, k + 1:] - knot_grid[:, 1:-k])
        bases = left * bases[:, :, :-1] + right * bases[:, :, 1:]
    silu_x = x2d * jax.nn.sigmoid(x2d)
    base_out = silu_x @ base_weight.T
    scaled_spline = spline_weight * spline_scaler[..., None]
    spline_out = bases.reshape(x2d.shape[0], -1) @ scaled_spline.reshape(OUT_FEATURES, -1).T
    out = base_out + spline_out
    return out.reshape(*orig_shape[:-1], OUT_FEATURES)


if __name__ == "__main__":
    key = jax.random.PRNGKey(0)
    k_x, k_bw, k_sw, k_ss = jax.random.split(key, 4)

    # deterministic synthetic parameters (shapes follow KANLinear.__init__)
    # TODO(synk): PyTorch's reset_parameters uses kaiming_uniform_ + a
    # torch.linalg.lstsq-based curve2coeff init; we use deterministic random
    # values of identical shapes instead (forward semantics are unaffected).
    h = (GRID_RANGE[1] - GRID_RANGE[0]) / GRID_SIZE
    grid_1d = (jnp.arange(-SPLINE_ORDER, GRID_SIZE + SPLINE_ORDER + 1,
                          dtype=jnp.float32) * h + GRID_RANGE[0])
    knot_grid = jnp.broadcast_to(grid_1d, (IN_FEATURES, GRID_PTS)).astype(jnp.float32)

    bound = 1.0 / math.sqrt(IN_FEATURES)
    base_weight = jax.random.uniform(k_bw, (OUT_FEATURES, IN_FEATURES),
                                     minval=-bound, maxval=bound, dtype=jnp.float32)
    spline_weight = 0.1 * jax.random.normal(
        k_sw, (OUT_FEATURES, IN_FEATURES, NUM_COEF), dtype=jnp.float32)
    spline_scaler = jax.random.uniform(k_ss, (OUT_FEATURES, IN_FEATURES),
                                       minval=-bound, maxval=bound, dtype=jnp.float32)

    # small input: (..., in_features); flattened batch = 2*4 = 8
    x = jax.random.normal(k_x, (2, 4, IN_FEATURES), dtype=jnp.float32)

    out = kan_linear_forward(x, knot_grid, base_weight, spline_weight, spline_scaler)
    out = jax.block_until_ready(out)

    ref = kan_linear_reference(x, knot_grid, base_weight, spline_weight, spline_scaler)
    assert out.shape == (2, 4, OUT_FEATURES)
    assert jnp.allclose(out, ref, rtol=1e-4, atol=1e-4), "mismatch vs reference"

    print("KERNEL_OK")
</pallas_src>

<mosaic_0001>
module attributes {stable_mosaic.version = 11 : i64} {
  func.func @kan_linear_kernel(%arg0: i32, %arg1: memref<1x16x128xf32, #tpu.memory_space<vmem>>, %arg2: memref<16x12xf32, #tpu.memory_space<vmem>>, %arg3: memref<3x16x11xf32, #tpu.memory_space<vmem>>, %arg4: memref<32x144xf32, #tpu.memory_space<vmem>>, %arg5: memref<1x32x128xf32, #tpu.memory_space<vmem>>, %arg6: memref<144x128xf32, #tpu.memory_space<vmem>>) attributes {dimension_semantics = [#tpu.dimension_semantics<parallel>], iteration_bounds = array<i64: 1>, scalar_prefetch = 0 : i64, scratch_operands = 1 : i64, tpu.core_type = #tpu.core_type<tc>, window_params = [{transform_indices = @transform_0, window_bounds = array<i64: 1, 16, 128>}, {pipeline_mode = #tpu.pipeline_mode<synchronous>, transform_indices = @transform_1, window_bounds = array<i64: 16, 12>}, {pipeline_mode = #tpu.pipeline_mode<synchronous>, transform_indices = @transform_2, window_bounds = array<i64: 3, 16, 11>}, {pipeline_mode = #tpu.pipeline_mode<synchronous>, transform_indices = @transform_3, window_bounds = array<i64: 32, 144>}, {transform_indices = @transform_4, window_bounds = array<i64: 1, 32, 128>}]} {
    %c0 = arith.constant 0 : index
    %c0_0 = arith.constant 0 : index
    %0 = vector.load %arg2[%c0, %c0_0] : memref<16x12xf32, #tpu.memory_space<vmem>>, vector<16x12xf32>
    %c0_1 = arith.constant 0 : index
    %c0_2 = arith.constant 0 : index
    %c0_3 = arith.constant 0 : index
    %1 = vector.load %arg3[%c0_1, %c0_2, %c0_3] : memref<3x16x11xf32, #tpu.memory_space<vmem>>, vector<3x16x11xf32>
    %c0_i32 = arith.constant 0 : i32
    %2 = arith.index_cast %c0_i32 : i32 to index
    %c0_4 = arith.constant 0 : index
    %c0_5 = arith.constant 0 : index
    %3 = vector.load %arg1[%2, %c0_4, %c0_5] : memref<1x16x128xf32, #tpu.memory_space<vmem>>, vector<1x16x128xf32>
    %4 = vector.shape_cast %3 : vector<1x16x128xf32> to vector<16x128xf32>
    %5 = arith.negf %4 : vector<16x128xf32>
    %6 = math.exp %5 : vector<16x128xf32>
    %cst = arith.constant 1.000000e+00 : f32
    %7 = vector.broadcast %cst : f32 to vector<16x128xf32>
    %8 = arith.addf %7, %6 : vector<16x128xf32>
    %9 = arith.divf %7, %8 : vector<16x128xf32>
    %10 = arith.mulf %4, %9 : vector<16x128xf32>
    %c0_6 = arith.constant 0 : index
    %c0_7 = arith.constant 0 : index
    %11 = vector.load %arg6[%c0_6, %c0_7] : memref<144x128xf32, #tpu.memory_space<vmem>>, vector<16x128xf32>
    tpu.vector_store %arg6[%c0_6, %c0_7], %10 {strides = array<i32>} : memref<144x128xf32, #tpu.memory_space<vmem>>, vector<16x128xf32>,
    %12 = vector.extract_strided_slice %0 {offsets = [0, 0], sizes = [16, 1], strides = [1, 1]} : vector<16x12xf32> to vector<16x1xf32>
    %13 = vector.broadcast %12 : vector<16x1xf32> to vector<16x128xf32>
    %14 = arith.cmpf oge, %4, %13 : vector<16x128xf32>
    %15 = arith.extui %14 : vector<16x128xi1> to vector<16x128xi32>
    %16 = arith.sitofp %15 : vector<16x128xi32> to vector<16x128xf32>
    %17 = vector.extract_strided_slice %0 {offsets = [0, 1], sizes = [16, 1], strides = [1, 1]} : vector<16x12xf32> to vector<16x1xf32>
    %18 = vector.broadcast %17 : vector<16x1xf32> to vector<16x128xf32>
    %19 = arith.cmpf oge, %4, %18 : vector<16x128xf32>
    %20 = arith.extui %19 : vector<16x128xi1> to vector<16x128xi32>
    %21 = arith.sitofp %20 : vector<16x128xi32> to vector<16x128xf32>
    %22 = vector.extract_strided_slice %0 {offsets = [0, 2], sizes = [16, 1], strides = [1, 1]} : vector<16x12xf32> to vector<16x1xf32>
    %23 = vector.broadcast %22 : vector<16x1xf32> to vector<16x128xf32>
    %24 = arith.cmpf oge, %4, %23 : vector<16x128xf32>
    %25 = arith.extui %24 : vector<16x128xi1> to vector<16x128xi32>
    %26 = arith.sitofp %25 : vector<16x128xi32> to vector<16x128xf32>
    %27 = vector.extract_strided_slice %0 {offsets = [0, 3], sizes = [16, 1], strides = [1, 1]} : vector<16x12xf32> to vector<16x1xf32>
    %28 = vector.broadcast %27 : vector<16x1xf32> to vector<16x128xf32>
    %29 = arith.cmpf oge, %4, %28 : vector<16x128xf32>
    %30 = arith.extui %29 : vector<16x128xi1> to vector<16x128xi32>
    %31 = arith.sitofp %30 : vector<16x128xi32> to vector<16x128xf32>
    %32 = vector.extract_strided_slice %0 {offsets = [0, 4], sizes = [16, 1], strides = [1, 1]} : vector<16x12xf32> to vector<16x1xf32>
    %33 = vector.broadcast %32 : vector<16x1xf32> to vector<16x128xf32>
    %34 = arith.cmpf oge, %4, %33 : vector<16x128xf32>
    %35 = arith.extui %34 : vector<16x128xi1> to vector<16x128xi32>
    %36 = arith.sitofp %35 : vector<16x128xi32> to vector<16x128xf32>
    %37 = vector.extract_strided_slice %0 {offsets = [0, 5], sizes = [16, 1], strides = [1, 1]} : vector<16x12xf32> to vector<16x1xf32>
    %38 = vector.broadcast %37 : vector<16x1xf32> to vector<16x128xf32>
    %39 = arith.cmpf oge, %4, %38 : vector<16x128xf32>
    %40 = arith.extui %39 : vector<16x128xi1> to vector<16x128xi32>
    %41 = arith.sitofp %40 : vector<16x128xi32> to vector<16x128xf32>
    %42 = vector.extract_strided_slice %0 {offsets = [0, 6], sizes = [16, 1], strides = [1, 1]} : vector<16x12xf32> to vector<16x1xf32>
    %43 = vector.broadcast %42 : vector<16x1xf32> to vector<16x128xf32>
    %44 = arith.cmpf oge, %4, %43 : vector<16x128xf32>
    %45 = arith.extui %44 : vector<16x128xi1> to vector<16x128xi32>
    %46 = arith.sitofp %45 : vector<16x128xi32> to vector<16x128xf32>
    %47 = vector.extract_strided_slice %0 {offsets = [0, 7], sizes = [16, 1], strides = [1, 1]} : vector<16x12xf32> to vector<16x1xf32>
    %48 = vector.broadcast %47 : vector<16x1xf32> to vector<16x128xf32>
    %49 = arith.cmpf oge, %4, %48 : vector<16x128xf32>
    %50 = arith.extui %49 : vector<16x128xi1> to vector<16x128xi32>
    %51 = arith.sitofp %50 : vector<16x128xi32> to vector<16x128xf32>
    %52 = vector.extract_strided_slice %0 {offsets = [0, 8], sizes = [16, 1], strides = [1, 1]} : vector<16x12xf32> to vector<16x1xf32>
    %53 = vector.broadcast %52 : vector<16x1xf32> to vector<16x128xf32>
    %54 = arith.cmpf oge, %4, %53 : vector<16x128xf32>
    %55 = arith.extui %54 : vector<16x128xi1> to vector<16x128xi32>
    %56 = arith.sitofp %55 : vector<16x128xi32> to vector<16x128xf32>
    %57 = vector.extract_strided_slice %0 {offsets = [0, 9], sizes = [16, 1], strides = [1, 1]} : vector<16x12xf32> to vector<16x1xf32>
    %58 = vector.broadcast %57 : vector<16x1xf32> to vector<16x128xf32>
    %59 = arith.cmpf oge, %4, %58 : vector<16x128xf32>
    %60 = arith.extui %59 : vector<16x128xi1> to vector<16x128xi32>
    %61 = arith.sitofp %60 : vector<16x128xi32> to vector<16x128xf32>
    %62 = vector.extract_strided_slice %0 {offsets = [0, 10], sizes = [16, 1], strides = [1, 1]} : vector<16x12xf32> to vector<16x1xf32>
    %63 = vector.broadcast %62 : vector<16x1xf32> to vector<16x128xf32>
    %64 = arith.cmpf oge, %4, %63 : vector<16x128xf32>
    %65 = arith.extui %64 : vector<16x128xi1> to vector<16x128xi32>
    %66 = arith.sitofp %65 : vector<16x128xi32> to vector<16x128xf32>
    %67 = vector.extract_strided_slice %0 {offsets = [0, 11], sizes = [16, 1], strides = [1, 1]} : vector<16x12xf32> to vector<16x1xf32>
    %68 = vector.broadcast %67 : vector<16x1xf32> to vector<16x128xf32>
    %69 = arith.cmpf oge, %4, %68 : vector<16x128xf32>
    %70 = arith.extui %69 : vector<16x128xi1> to vector<16x128xi32>
    %71 = arith.sitofp %70 : vector<16x128xi32> to vector<16x128xf32>
    %72 = arith.subf %16, %21 : vector<16x128xf32>
    %73 = arith.subf %21, %26 : vector<16x128xf32>
    %74 = arith.subf %26, %31 : vector<16x128xf32>
    %75 = arith.subf %31, %36 : vector<16x128xf32>
    %76 = arith.subf %36, %41 : vector<16x128xf32>
    %77 = arith.subf %41, %46 : vector<16x128xf32>
    %78 = arith.subf %46, %51 : vector<16x128xf32>
    %79 = arith.subf %51, %56 : vector<16x128xf32>
    %80 = arith.subf %56, %61 : vector<16x128xf32>
    %81 = arith.subf %61, %66 : vector<16x128xf32>
    %82 = arith.subf %66, %71 : vector<16x128xf32>
    %83 = vector.extract_strided_slice %0 {offsets = [0, 0], sizes = [16, 1], strides = [1, 1]} : vector<16x12xf32> to vector<16x1xf32>
    %84 = vector.broadcast %83 : vector<16x1xf32> to vector<16x128xf32>
    %85 = arith.subf %4, %84 : vector<16x128xf32>
    %86 = vector.extract_strided_slice %1 {offsets = [0, 0, 0], sizes = [1, 16, 1], strides = [1, 1, 1]} : vector<3x16x11xf32> to vector<1x16x1xf32>
    %87 = vector.shape_cast %86 : vector<1x16x1xf32> to vector<16x1xf32>
    %88 = vector.broadcast %87 : vector<16x1xf32> to vector<16x128xf32>
    %89 = arith.mulf %85, %88 : vector<16x128xf32>
    %90 = arith.mulf %89, %72 : vector<16x128xf32>
    %91 = vector.extract_strided_slice %0 {offsets = [0, 1], sizes = [16, 1], strides = [1, 1]} : vector<16x12xf32> to vector<16x1xf32>
    %92 = vector.broadcast %91 : vector<16x1xf32> to vector<16x128xf32>
    %93 = arith.subf %4, %92 : vector<16x128xf32>
    %94 = vector.extract_strided_slice %1 {offsets = [0, 0, 1], sizes = [1, 16, 1], strides = [1, 1, 1]} : vector<3x16x11xf32> to vector<1x16x1xf32>
    %95 = vector.shape_cast %94 : vector<1x16x1xf32> to vector<16x1xf32>
    %96 = vector.broadcast %95 : vector<16x1xf32> to vector<16x128xf32>
    %97 = arith.mulf %93, %96 : vector<16x128xf32>
    %98 = arith.mulf %97, %73 : vector<16x128xf32>
    %99 = arith.addf %73, %90 : vector<16x128xf32>
    %100 = arith.subf %99, %98 : vector<16x128xf32>
    %101 = vector.extract_strided_slice %0 {offsets = [0, 2], sizes = [16, 1], strides = [1, 1]} : vector<16x12xf32> to vector<16x1xf32>
    %102 = vector.broadcast %101 : vector<16x1xf32> to vector<16x128xf32>
    %103 = arith.subf %4, %102 : vector<16x128xf32>
    %104 = vector.extract_strided_slice %1 {offsets = [0, 0, 2], sizes = [1, 16, 1], strides = [1, 1, 1]} : vector<3x16x11xf32> to vector<1x16x1xf32>
    %105 = vector.shape_cast %104 : vector<1x16x1xf32> to vector<16x1xf32>
    %106 = vector.broadcast %105 : vector<16x1xf32> to vector<16x128xf32>
    %107 = arith.mulf %103, %106 : vector<16x128xf32>
    %108 = arith.mulf %107, %74 : vector<16x128xf32>
    %109 = arith.addf %74, %98 : vector<16x128xf32>
    %110 = arith.subf %109, %108 : vector<16x128xf32>
    %111 = vector.extract_strided_slice %0 {offsets = [0, 3], sizes = [16, 1], strides = [1, 1]} : vector<16x12xf32> to vector<16x1xf32>
    %112 = vector.broadcast %111 : vector<16x1xf32> to vector<16x128xf32>
    %113 = arith.subf %4, %112 : vector<16x128xf32>
    %114 = vector.extract_strided_slice %1 {offsets = [0, 0, 3], sizes = [1, 16, 1], strides = [1, 1, 1]} : vector<3x16x11xf32> to vector<1x16x1xf32>
    %115 = vector.shape_cast %114 : vector<1x16x1xf32> to vector<16x1xf32>
    %116 = vector.broadcast %115 : vector<16x1xf32> to vector<16x128xf32>
    %117 = arith.mulf %113, %116 : vector<16x128xf32>
    %118 = arith.mulf %117, %75 : vector<16x128xf32>
    %119 = arith.addf %75, %108 : vector<16x128xf32>
    %120 = arith.subf %119, %118 : vector<16x128xf32>
    %121 = vector.extract_strided_slice %0 {offsets = [0, 4], sizes = [16, 1], strides = [1, 1]} : vector<16x12xf32> to vector<16x1xf32>
    %122 = vector.broadcast %121 : vector<16x1xf32> to vector<16x128xf32>
    %123 = arith.subf %4, %122 : vector<16x128xf32>
    %124 = vector.extract_strided_slice %1 {offsets = [0, 0, 4], sizes = [1, 16, 1], strides = [1, 1, 1]} : vector<3x16x11xf32> to vector<1x16x1xf32>
    %125 = vector.shape_cast %124 : vector<1x16x1xf32> to vector<16x1xf32>
    %126 = vector.broadcast %125 : vector<16x1xf32> to vector<16x128xf32>
    %127 = arith.mulf %123, %126 : vector<16x128xf32>
    %128 = arith.mulf %127, %76 : vector<16x128xf32>
    %129 = arith.addf %76, %118 : vector<16x128xf32>
    %130 = arith.subf %129, %128 : vector<16x128xf32>
    %131 = vector.extract_strided_slice %0 {offsets = [0, 5], sizes = [16, 1], strides = [1, 1]} : vector<16x12xf32> to vector<16x1xf32>
    %132 = vector.broadcast %131 : vector<16x1xf32> to vector<16x128xf32>
    %133 = arith.subf %4, %132 : vector<16x128xf32>
    %134 = vector.extract_strided_slice %1 {offsets = [0, 0, 5], sizes = [1, 16, 1], strides = [1, 1, 1]} : vector<3x16x11xf32> to vector<1x16x1xf32>
    %135 = vector.shape_cast %134 : vector<1x16x1xf32> to vector<16x1xf32>
    %136 = vector.broadcast %135 : vector<16x1xf32> to vector<16x128xf32>
    %137 = arith.mulf %133, %136 : vector<16x128xf32>
    %138 = arith.mulf %137, %77 : vector<16x128xf32>
    %139 = arith.addf %77, %128 : vector<16x128xf32>
    %140 = arith.subf %139, %138 : vector<16x128xf32>
    %141 = vector.extract_strided_slice %0 {offsets = [0, 6], sizes = [16, 1], strides = [1, 1]} : vector<16x12xf32> to vector<16x1xf32>
    %142 = vector.broadcast %141 : vector<16x1xf32> to vector<16x128xf32>
    %143 = arith.subf %4, %142 : vector<16x128xf32>
    %144 = vector.extract_strided_slice %1 {offsets = [0, 0, 6], sizes = [1, 16, 1], strides = [1, 1, 1]} : vector<3x16x11xf32> to vector<1x16x1xf32>
    %145 = vector.shape_cast %144 : vector<1x16x1xf32> to vector<16x1xf32>
    %146 = vector.broadcast %145 : vector<16x1xf32> to vector<16x128xf32>
    %147 = arith.mulf %143, %146 : vector<16x128xf32>
    %148 = arith.mulf %147, %78 : vector<16x128xf32>
    %149 = arith.addf %78, %138 : vector<16x128xf32>
    %150 = arith.subf %149, %148 : vector<16x128xf32>
    %151 = vector.extract_strided_slice %0 {offsets = [0, 7], sizes = [16, 1], strides = [1, 1]} : vector<16x12xf32> to vector<16x1xf32>
    %152 = vector.broadcast %151 : vector<16x1xf32> to vector<16x128xf32>
    %153 = arith.subf %4, %152 : vector<16x128xf32>
    %154 = vector.extract_strided_slice %1 {offsets = [0, 0, 7], sizes = [1, 16, 1], strides = [1, 1, 1]} : vector<3x16x11xf32> to vector<1x16x1xf32>
    %155 = vector.shape_cast %154 : vector<1x16x1xf32> to vector<16x1xf32>
    %156 = vector.broadcast %155 : vector<16x1xf32> to vector<16x128xf32>
    %157 = arith.mulf %153, %156 : vector<16x128xf32>
    %158 = arith.mulf %157, %79 : vector<16x128xf32>
    %159 = arith.addf %79, %148 : vector<16x128xf32>
    %160 = arith.subf %159, %158 : vector<16x128xf32>
    %161 = vector.extract_strided_slice %0 {offsets = [0, 8], sizes = [16, 1], strides = [1, 1]} : vector<16x12xf32> to vector<16x1xf32>
    %162 = vector.broadcast %161 : vector<16x1xf32> to vector<16x128xf32>
    %163 = arith.subf %4, %162 : vector<16x128xf32>
    %164 = vector.extract_strided_slice %1 {offsets = [0, 0, 8], sizes = [1, 16, 1], strides = [1, 1, 1]} : vector<3x16x11xf32> to vector<1x16x1xf32>
    %165 = vector.shape_cast %164 : vector<1x16x1xf32> to vector<16x1xf32>
    %166 = vector.broadcast %165 : vector<16x1xf32> to vector<16x128xf32>
    %167 = arith.mulf %163, %166 : vector<16x128xf32>
    %168 = arith.mulf %167, %80 : vector<16x128xf32>
    %169 = arith.addf %80, %158 : vector<16x128xf32>
    %170 = arith.subf %169, %168 : vector<16x128xf32>
    %171 = vector.extract_strided_slice %0 {offsets = [0, 9], sizes = [16, 1], strides = [1, 1]} : vector<16x12xf32> to vector<16x1xf32>
    %172 = vector.broadcast %171 : vector<16x1xf32> to vector<16x128xf32>
    %173 = arith.subf %4, %172 : vector<16x128xf32>
    %174 = vector.extract_strided_slice %1 {offsets = [0, 0, 9], sizes = [1, 16, 1], strides = [1, 1, 1]} : vector<3x16x11xf32> to vector<1x16x1xf32>
    %175 = vector.shape_cast %174 : vector<1x16x1xf32> to vector<16x1xf32>
    %176 = vector.broadcast %175 : vector<16x1xf32> to vector<16x128xf32>
    %177 = arith.mulf %173, %176 : vector<16x128xf32>
    %178 = arith.mulf %177, %81 : vector<16x128xf32>
    %179 = arith.addf %81, %168 : vector<16x128xf32>
    %180 = arith.subf %179, %178 : vector<16x128xf32>
    %181 = vector.extract_strided_slice %0 {offsets = [0, 10], sizes = [16, 1], strides = [1, 1]} : vector<16x12xf32> to vector<16x1xf32>
    %182 = vector.broadcast %181 : vector<16x1xf32> to vector<16x128xf32>
    %183 = arith.subf %4, %182 : vector<16x128xf32>
    %184 = vector.extract_strided_slice %1 {offsets = [0, 0, 10], sizes = [1, 16, 1], strides = [1, 1, 1]} : vector<3x16x11xf32> to vector<1x16x1xf32>
    %185 = vector.shape_cast %184 : vector<1x16x1xf32> to vector<16x1xf32>
    %186 = vector.broadcast %185 : vector<16x1xf32> to vector<16x128xf32>
    %187 = arith.mulf %183, %186 : vector<16x128xf32>
    %188 = arith.mulf %187, %82 : vector<16x128xf32>
    %189 = arith.addf %82, %178 : vector<16x128xf32>
    %190 = arith.subf %189, %188 : vector<16x128xf32>
    %191 = vector.extract_strided_slice %0 {offsets = [0, 0], sizes = [16, 1], strides = [1, 1]} : vector<16x12xf32> to vector<16x1xf32>
    %192 = vector.broadcast %191 : vector<16x1xf32> to vector<16x128xf32>
    %193 = arith.subf %4, %192 : vector<16x128xf32>
    %194 = vector.extract_strided_slice %1 {offsets = [1, 0, 0], sizes = [1, 16, 1], strides = [1, 1, 1]} : vector<3x16x11xf32> to vector<1x16x1xf32>
    %195 = vector.shape_cast %194 : vector<1x16x1xf32> to vector<16x1xf32>
    %196 = vector.broadcast %195 : vector<16x1xf32> to vector<16x128xf32>
    %197 = arith.mulf %193, %196 : vector<16x128xf32>
    %198 = arith.mulf %197, %100 : vector<16x128xf32>
    %199 = vector.extract_strided_slice %0 {offsets = [0, 1], sizes = [16, 1], strides = [1, 1]} : vector<16x12xf32> to vector<16x1xf32>
    %200 = vector.broadcast %199 : vector<16x1xf32> to vector<16x128xf32>
    %201 = arith.subf %4, %200 : vector<16x128xf32>
    %202 = vector.extract_strided_slice %1 {offsets = [1, 0, 1], sizes = [1, 16, 1], strides = [1, 1, 1]} : vector<3x16x11xf32> to vector<1x16x1xf32>
    %203 = vector.shape_cast %202 : vector<1x16x1xf32> to vector<16x1xf32>
    %204 = vector.broadcast %203 : vector<16x1xf32> to vector<16x128xf32>
    %205 = arith.mulf %201, %204 : vector<16x128xf32>
    %206 = arith.mulf %205, %110 : vector<16x128xf32>
    %207 = arith.addf %110, %198 : vector<16x128xf32>
    %208 = arith.subf %207, %206 : vector<16x128xf32>
    %209 = vector.extract_strided_slice %0 {offsets = [0, 2], sizes = [16, 1], strides = [1, 1]} : vector<16x12xf32> to vector<16x1xf32>
    %210 = vector.broadcast %209 : vector<16x1xf32> to vector<16x128xf32>
    %211 = arith.subf %4, %210 : vector<16x128xf32>
    %212 = vector.extract_strided_slice %1 {offsets = [1, 0, 2], sizes = [1, 16, 1], strides = [1, 1, 1]} : vector<3x16x11xf32> to vector<1x16x1xf32>
    %213 = vector.shape_cast %212 : vector<1x16x1xf32> to vector<16x1xf32>
    %214 = vector.broadcast %213 : vector<16x1xf32> to vector<16x128xf32>
    %215 = arith.mulf %211, %214 : vector<16x128xf32>
    %216 = arith.mulf %215, %120 : vector<16x128xf32>
    %217 = arith.addf %120, %206 : vector<16x128xf32>
    %218 = arith.subf %217, %216 : vector<16x128xf32>
    %219 = vector.extract_strided_slice %0 {offsets = [0, 3], sizes = [16, 1], strides = [1, 1]} : vector<16x12xf32> to vector<16x1xf32>
    %220 = vector.broadcast %219 : vector<16x1xf32> to vector<16x128xf32>
    %221 = arith.subf %4, %220 : vector<16x128xf32>
    %222 = vector.extract_strided_slice %1 {offsets = [1, 0, 3], sizes = [1, 16, 1], strides = [1, 1, 1]} : vector<3x16x11xf32> to vector<1x16x1xf32>
    %223 = vector.shape_cast %222 : vector<1x16x1xf32> to vector<16x1xf32>
    %224 = vector.broadcast %223 : vector<16x1xf32> to vector<16x128xf32>
    %225 = arith.mulf %221, %224 : vector<16x128xf32>
    %226 = arith.mulf %225, %130 : vector<16x128xf32>
    %227 = arith.addf %130, %216 : vector<16x128xf32>
    %228 = arith.subf %227, %226 : vector<16x128xf32>
    %229 = vector.extract_strided_slice %0 {offsets = [0, 4], sizes = [16, 1], strides = [1, 1]} : vector<16x12xf32> to vector<16x1xf32>
    %230 = vector.broadcast %229 : vector<16x1xf32> to vector<16x128xf32>
    %231 = arith.subf %4, %230 : vector<16x128xf32>
    %232 = vector.extract_strided_slice %1 {offsets = [1, 0, 4], sizes = [1, 16, 1], strides = [1, 1, 1]} : vector<3x16x11xf32> to vector<1x16x1xf32>
    %233 = vector.shape_cast %232 : vector<1x16x1xf32> to vector<16x1xf32>
    %234 = vector.broadcast %233 : vector<16x1xf32> to vector<16x128xf32>
    %235 = arith.mulf %231, %234 : vector<16x128xf32>
    %236 = arith.mulf %235, %140 : vector<16x128xf32>
    %237 = arith.addf %140, %226 : vector<16x128xf32>
    %238 = arith.subf %237, %236 : vector<16x128xf32>
    %239 = vector.extract_strided_slice %0 {offsets = [0, 5], sizes = [16, 1], strides = [1, 1]} : vector<16x12xf32> to vector<16x1xf32>
    %240 = vector.broadcast %239 : vector<16x1xf32> to vector<16x128xf32>
    %241 = arith.subf %4, %240 : vector<16x128xf32>
    %242 = vector.extract_strided_slice %1 {offsets = [1, 0, 5], sizes = [1, 16, 1], strides = [1, 1, 1]} : vector<3x16x11xf32> to vector<1x16x1xf32>
    %243 = vector.shape_cast %242 : vector<1x16x1xf32> to vector<16x1xf32>
    %244 = vector.broadcast %243 : vector<16x1xf32> to vector<16x128xf32>
    %245 = arith.mulf %241, %244 : vector<16x128xf32>
    %246 = arith.mulf %245, %150 : vector<16x128xf32>
    %247 = arith.addf %150, %236 : vector<16x128xf32>
    %248 = arith.subf %247, %246 : vector<16x128xf32>
    %249 = vector.extract_strided_slice %0 {offsets = [0, 6], sizes = [16, 1], strides = [1, 1]} : vector<16x12xf32> to vector<16x1xf32>
    %250 = vector.broadcast %249 : vector<16x1xf32> to vector<16x128xf32>
    %251 = arith.subf %4, %250 : vector<16x128xf32>
    %252 = vector.extract_strided_slice %1 {offsets = [1, 0, 6], sizes = [1, 16, 1], strides = [1, 1, 1]} : vector<3x16x11xf32> to vector<1x16x1xf32>
    %253 = vector.shape_cast %252 : vector<1x16x1xf32> to vector<16x1xf32>
    %254 = vector.broadcast %253 : vector<16x1xf32> to vector<16x128xf32>
    %255 = arith.mulf %251, %254 : vector<16x128xf32>
    %256 = arith.mulf %255, %160 : vector<16x128xf32>
    %257 = arith.addf %160, %246 : vector<16x128xf32>
    %258 = arith.subf %257, %256 : vector<16x128xf32>
    %259 = vector.extract_strided_slice %0 {offsets = [0, 7], sizes = [16, 1], strides = [1, 1]} : vector<16x12xf32> to vector<16x1xf32>
    %260 = vector.broadcast %259 : vector<16x1xf32> to vector<16x128xf32>
    %261 = arith.subf %4, %260 : vector<16x128xf32>
    %262 = vector.extract_strided_slice %1 {offsets = [1, 0, 7], sizes = [1, 16, 1], strides = [1, 1, 1]} : vector<3x16x11xf32> to vector<1x16x1xf32>
    %263 = vector.shape_cast %262 : vector<1x16x1xf32> to vector<16x1xf32>
    %264 = vector.broadcast %263 : vector<16x1xf32> to vector<16x128xf32>
    %265 = arith.mulf %261, %264 : vector<16x128xf32>
    %266 = arith.mulf %265, %170 : vector<16x128xf32>
    %267 = arith.addf %170, %256 : vector<16x128xf32>
    %268 = arith.subf %267, %266 : vector<16x128xf32>
    %269 = vector.extract_strided_slice %0 {offsets = [0, 8], sizes = [16, 1], strides = [1, 1]} : vector<16x12xf32> to vector<16x1xf32>
    %270 = vector.broadcast %269 : vector<16x1xf32> to vector<16x128xf32>
    %271 = arith.subf %4, %270 : vector<16x128xf32>
    %272 = vector.extract_strided_slice %1 {offsets = [1, 0, 8], sizes = [1, 16, 1], strides = [1, 1, 1]} : vector<3x16x11xf32> to vector<1x16x1xf32>
    %273 = vector.shape_cast %272 : vector<1x16x1xf32> to vector<16x1xf32>
    %274 = vector.broadcast %273 : vector<16x1xf32> to vector<16x128xf32>
    %275 = arith.mulf %271, %274 : vector<16x128xf32>
    %276 = arith.mulf %275, %180 : vector<16x128xf32>
    %277 = arith.addf %180, %266 : vector<16x128xf32>
    %278 = arith.subf %277, %276 : vector<16x128xf32>
    %279 = vector.extract_strided_slice %0 {offsets = [0, 9], sizes = [16, 1], strides = [1, 1]} : vector<16x12xf32> to vector<16x1xf32>
    %280 = vector.broadcast %279 : vector<16x1xf32> to vector<16x128xf32>
    %281 = arith.subf %4, %280 : vector<16x128xf32>
    %282 = vector.extract_strided_slice %1 {offsets = [1, 0, 9], sizes = [1, 16, 1], strides = [1, 1, 1]} : vector<3x16x11xf32> to vector<1x16x1xf32>
    %283 = vector.shape_cast %282 : vector<1x16x1xf32> to vector<16x1xf32>
    %284 = vector.broadcast %283 : vector<16x1xf32> to vector<16x128xf32>
    %285 = arith.mulf %281, %284 : vector<16x128xf32>
    %286 = arith.mulf %285, %190 : vector<16x128xf32>
    %287 = arith.addf %190, %276 : vector<16x128xf32>
    %288 = arith.subf %287, %286 : vector<16x128xf32>
    %289 = vector.extract_strided_slice %0 {offsets = [0, 0], sizes = [16, 1], strides = [1, 1]} : vector<16x12xf32> to vector<16x1xf32>
    %290 = vector.broadcast %289 : vector<16x1xf32> to vector<16x128xf32>
    %291 = arith.subf %4, %290 : vector<16x128xf32>
    %292 = vector.extract_strided_slice %1 {offsets = [2, 0, 0], sizes = [1, 16, 1], strides = [1, 1, 1]} : vector<3x16x11xf32> to vector<1x16x1xf32>
    %293 = vector.shape_cast %292 : vector<1x16x1xf32> to vector<16x1xf32>
    %294 = vector.broadcast %293 : vector<16x1xf32> to vector<16x128xf32>
    %295 = arith.mulf %291, %294 : vector<16x128xf32>
    %296 = arith.mulf %295, %208 : vector<16x128xf32>
    %297 = vector.extract_strided_slice %0 {offsets = [0, 1], sizes = [16, 1], strides = [1, 1]} : vector<16x12xf32> to vector<16x1xf32>
    %298 = vector.broadcast %297 : vector<16x1xf32> to vector<16x128xf32>
    %299 = arith.subf %4, %298 : vector<16x128xf32>
    %300 = vector.extract_strided_slice %1 {offsets = [2, 0, 1], sizes = [1, 16, 1], strides = [1, 1, 1]} : vector<3x16x11xf32> to vector<1x16x1xf32>
    %301 = vector.shape_cast %300 : vector<1x16x1xf32> to vector<16x1xf32>
    %302 = vector.broadcast %301 : vector<16x1xf32> to vector<16x128xf32>
    %303 = arith.mulf %299, %302 : vector<16x128xf32>
    %304 = arith.mulf %303, %218 : vector<16x128xf32>
    %305 = arith.addf %218, %296 : vector<16x128xf32>
    %306 = arith.subf %305, %304 : vector<16x128xf32>
    %c16 = arith.constant 16 : index
    %c0_8 = arith.constant 0 : index
    %307 = vector.load %arg6[%c16, %c0_8] : memref<144x128xf32, #tpu.memory_space<vmem>>, vector<16x128xf32>
    tpu.vector_store %arg6[%c16, %c0_8], %306 {strides = array<i32>} : memref<144x128xf32, #tpu.memory_space<vmem>>, vector<16x128xf32>,
    %308 = vector.extract_strided_slice %0 {offsets = [0, 2], sizes = [16, 1], strides = [1, 1]} : vector<16x12xf32> to vector<16x1xf32>
    %309 = vector.broadcast %308 : vector<16x1xf32> to vector<16x128xf32>
    %310 = arith.subf %4, %309 : vector<16x128xf32>
    %311 = vector.extract_strided_slice %1 {offsets = [2, 0, 2], sizes = [1, 16, 1], strides = [1, 1, 1]} : vector<3x16x11xf32> to vector<1x16x1xf32>
    %312 = vector.shape_cast %311 : vector<1x16x1xf32> to vector<16x1xf32>
    %313 = vector.broadcast %312 : vector<16x1xf32> to vector<16x128xf32>
    %314 = arith.mulf %310, %313 : vector<16x128xf32>
    %315 = arith.mulf %314, %228 : vector<16x128xf32>
    %316 = arith.addf %228, %304 : vector<16x128xf32>
    %317 = arith.subf %316, %315 : vector<16x128xf32>
    %c32 = arith.constant 32 : index
    %c0_9 = arith.constant 0 : index
    %318 = vector.load %arg6[%c32, %c0_9] : memref<144x128xf32, #tpu.memory_space<vmem>>, vector<16x128xf32>
    tpu.vector_store %arg6[%c32, %c0_9], %317 {strides = array<i32>} : memref<144x128xf32, #tpu.memory_space<vmem>>, vector<16x128xf32>,
    %319 = vector.extract_strided_slice %0 {offsets = [0, 3], sizes = [16, 1], strides = [1, 1]} : vector<16x12xf32> to vector<16x1xf32>
    %320 = vector.broadcast %319 : vector<16x1xf32> to vector<16x128xf32>
    %321 = arith.subf %4, %320 : vector<16x128xf32>
    %322 = vector.extract_strided_slice %1 {offsets = [2, 0, 3], sizes = [1, 16, 1], strides = [1, 1, 1]} : vector<3x16x11xf32> to vector<1x16x1xf32>
    %323 = vector.shape_cast %322 : vector<1x16x1xf32> to vector<16x1xf32>
    %324 = vector.broadcast %323 : vector<16x1xf32> to vector<16x128xf32>
    %325 = arith.mulf %321, %324 : vector<16x128xf32>
    %326 = arith.mulf %325, %238 : vector<16x128xf32>
    %327 = arith.addf %238, %315 : vector<16x128xf32>
    %328 = arith.subf %327, %326 : vector<16x128xf32>
    %c48 = arith.constant 48 : index
    %c0_10 = arith.constant 0 : index
    %329 = vector.load %arg6[%c48, %c0_10] : memref<144x128xf32, #tpu.memory_space<vmem>>, vector<16x128xf32>
    tpu.vector_store %arg6[%c48, %c0_10], %328 {strides = array<i32>} : memref<144x128xf32, #tpu.memory_space<vmem>>, vector<16x128xf32>,
    %330 = vector.extract_strided_slice %0 {offsets = [0, 4], sizes = [16, 1], strides = [1, 1]} : vector<16x12xf32> to vector<16x1xf32>
    %331 = vector.broadcast %330 : vector<16x1xf32> to vector<16x128xf32>
    %332 = arith.subf %4, %331 : vector<16x128xf32>
    %333 = vector.extract_strided_slice %1 {offsets = [2, 0, 4], sizes = [1, 16, 1], strides = [1, 1, 1]} : vector<3x16x11xf32> to vector<1x16x1xf32>
    %334 = vector.shape_cast %333 : vector<1x16x1xf32> to vector<16x1xf32>
    %335 = vector.broadcast %334 : vector<16x1xf32> to vector<16x128xf32>
    %336 = arith.mulf %332, %335 : vector<16x128xf32>
    %337 = arith.mulf %336, %248 : vector<16x128xf32>
    %338 = arith.addf %248, %326 : vector<16x128xf32>
    %339 = arith.subf %338, %337 : vector<16x128xf32>
    %c64 = arith.constant 64 : index
    %c0_11 = arith.constant 0 : index
    %340 = vector.load %arg6[%c64, %c0_11] : memref<144x128xf32, #tpu.memory_space<vmem>>, vector<16x128xf32>
    tpu.vector_store %arg6[%c64, %c0_11], %339 {strides = array<i32>} : memref<144x128xf32, #tpu.memory_space<vmem>>, vector<16x128xf32>,
    %341 = vector.extract_strided_slice %0 {offsets = [0, 5], sizes = [16, 1], strides = [1, 1]} : vector<16x12xf32> to vector<16x1xf32>
    %342 = vector.broadcast %341 : vector<16x1xf32> to vector<16x128xf32>
    %343 = arith.subf %4, %342 : vector<16x128xf32>
    %344 = vector.extract_strided_slice %1 {offsets = [2, 0, 5], sizes = [1, 16, 1], strides = [1, 1, 1]} : vector<3x16x11xf32> to vector<1x16x1xf32>
    %345 = vector.shape_cast %344 : vector<1x16x1xf32> to vector<16x1xf32>
    %346 = vector.broadcast %345 : vector<16x1xf32> to vector<16x128xf32>
    %347 = arith.mulf %343, %346 : vector<16x128xf32>
    %348 = arith.mulf %347, %258 : vector<16x128xf32>
    %349 = arith.addf %258, %337 : vector<16x128xf32>
    %350 = arith.subf %349, %348 : vector<16x128xf32>
    %c80 = arith.constant 80 : index
    %c0_12 = arith.constant 0 : index
    %351 = vector.load %arg6[%c80, %c0_12] : memref<144x128xf32, #tpu.memory_space<vmem>>, vector<16x128xf32>
    tpu.vector_store %arg6[%c80, %c0_12], %350 {strides = array<i32>} : memref<144x128xf32, #tpu.memory_space<vmem>>, vector<16x128xf32>,
    %352 = vector.extract_strided_slice %0 {offsets = [0, 6], sizes = [16, 1], strides = [1, 1]} : vector<16x12xf32> to vector<16x1xf32>
    %353 = vector.broadcast %352 : vector<16x1xf32> to vector<16x128xf32>
    %354 = arith.subf %4, %353 : vector<16x128xf32>
    %355 = vector.extract_strided_slice %1 {offsets = [2, 0, 6], sizes = [1, 16, 1], strides = [1, 1, 1]} : vector<3x16x11xf32> to vector<1x16x1xf32>
    %356 = vector.shape_cast %355 : vector<1x16x1xf32> to vector<16x1xf32>
    %357 = vector.broadcast %356 : vector<16x1xf32> to vector<16x128xf32>
    %358 = arith.mulf %354, %357 : vector<16x128xf32>
    %359 = arith.mulf %358, %268 : vector<16x128xf32>
    %360 = arith.addf %268, %348 : vector<16x128xf32>
    %361 = arith.subf %360, %359 : vector<16x128xf32>
    %c96 = arith.constant 96 : index
    %c0_13 = arith.constant 0 : index
    %362 = vector.load %arg6[%c96, %c0_13] : memref<144x128xf32, #tpu.memory_space<vmem>>, vector<16x128xf32>
    tpu.vector_store %arg6[%c96, %c0_13], %361 {strides = array<i32>} : memref<144x128xf32, #tpu.memory_space<vmem>>, vector<16x128xf32>,
    %363 = vector.extract_strided_slice %0 {offsets = [0, 7], sizes = [16, 1], strides = [1, 1]} : vector<16x12xf32> to vector<16x1xf32>
    %364 = vector.broadcast %363 : vector<16x1xf32> to vector<16x128xf32>
    %365 = arith.subf %4, %364 : vector<16x128xf32>
    %366 = vector.extract_strided_slice %1 {offsets = [2, 0, 7], sizes = [1, 16, 1], strides = [1, 1, 1]} : vector<3x16x11xf32> to vector<1x16x1xf32>
    %367 = vector.shape_cast %366 : vector<1x16x1xf32> to vector<16x1xf32>
    %368 = vector.broadcast %367 : vector<16x1xf32> to vector<16x128xf32>
    %369 = arith.mulf %365, %368 : vector<16x128xf32>
    %370 = arith.mulf %369, %278 : vector<16x128xf32>
    %371 = arith.addf %278, %359 : vector<16x128xf32>
    %372 = arith.subf %371, %370 : vector<16x128xf32>
    %c112 = arith.constant 112 : index
    %c0_14 = arith.constant 0 : index
    %373 = vector.load %arg6[%c112, %c0_14] : memref<144x128xf32, #tpu.memory_space<vmem>>, vector<16x128xf32>
    tpu.vector_store %arg6[%c112, %c0_14], %372 {strides = array<i32>} : memref<144x128xf32, #tpu.memory_space<vmem>>, vector<16x128xf32>,
    %374 = vector.extract_strided_slice %0 {offsets = [0, 8], sizes = [16, 1], strides = [1, 1]} : vector<16x12xf32> to vector<16x1xf32>
    %375 = vector.broadcast %374 : vector<16x1xf32> to vector<16x128xf32>
    %376 = arith.subf %4, %375 : vector<16x128xf32>
    %377 = vector.extract_strided_slice %1 {offsets = [2, 0, 8], sizes = [1, 16, 1], strides = [1, 1, 1]} : vector<3x16x11xf32> to vector<1x16x1xf32>
    %378 = vector.shape_cast %377 : vector<1x16x1xf32> to vector<16x1xf32>
    %379 = vector.broadcast %378 : vector<16x1xf32> to vector<16x128xf32>
    %380 = arith.mulf %376, %379 : vector<16x128xf32>
    %381 = arith.mulf %380, %288 : vector<16x128xf32>
    %382 = arith.addf %288, %370 : vector<16x128xf32>
    %383 = arith.subf %382, %381 : vector<16x128xf32>
    %c128 = arith.constant 128 : index
    %c0_15 = arith.constant 0 : index
    %384 = vector.load %arg6[%c128, %c0_15] : memref<144x128xf32, #tpu.memory_space<vmem>>, vector<16x128xf32>
    tpu.vector_store %arg6[%c128, %c0_15], %383 {strides = array<i32>} : memref<144x128xf32, #tpu.memory_space<vmem>>, vector<16x128xf32>,
    %c0_16 = arith.constant 0 : index
    %c0_17 = arith.constant 0 : index
    %385 = vector.load %arg4[%c0_16, %c0_17] : memref<32x144xf32, #tpu.memory_space<vmem>>, vector<32x144xf32>
    %c0_18 = arith.constant 0 : index
    %c0_19 = arith.constant 0 : index
    %386 = vector.load %arg6[%c0_18, %c0_19] : memref<144x128xf32, #tpu.memory_space<vmem>>, vector<144x128xf32>
    %cst_20 = arith.constant dense<0.000000e+00> : vector<32x128xf32>
    %387 = tpu.matmul %385, %386, %cst_20 {dimension_numbers = #tpu.dot_dimension_numbers<[1], [0], [0], [1], [0, 0, 1, 1], [], []>} : vector<32x144xf32>, vector<144x128xf32>, vector<32x128xf32> -> vector<32x128xf32>
    %388 = arith.index_cast %c0_i32 : i32 to index
    %c0_21 = arith.constant 0 : index
    %c0_22 = arith.constant 0 : index
    %389 = vector.load %arg5[%388, %c0_21, %c0_22] : memref<1x32x128xf32, #tpu.memory_space<vmem>>, vector<1x32x128xf32>
    %390 = vector.shape_cast %389 : vector<1x32x128xf32> to vector<32x128xf32>
    %391 = vector.shape_cast %387 : vector<32x128xf32> to vector<1x32x128xf32>
    tpu.vector_store %arg5[%388, %c0_21, %c0_22], %391 {strides = array<i32>} : memref<1x32x128xf32, #tpu.memory_space<vmem>>, vector<1x32x128xf32>,
    %c1_i32 = arith.constant 1 : i32
    return
  }
  func.func @transform_0(%arg0: i32) -> (i32, i32, i32) {
    %c0_i32 = arith.constant 0 : i32
    %c0_i32_0 = arith.constant 0 : i32
    %c0_i32_1 = arith.constant 0 : i32
    return %arg0, %c0_i32, %c0_i32_0 : i32, i32, i32
  }
  func.func @transform_1(%arg0: i32) -> (i32, i32) {
    %c0_i32 = arith.constant 0 : i32
    %c0_i32_0 = arith.constant 0 : i32
    %c0_i32_1 = arith.constant 0 : i32
    return %c0_i32, %c0_i32_0 : i32, i32
  }
  func.func @transform_2(%arg0: i32) -> (i32, i32, i32) {
    %c0_i32 = arith.constant 0 : i32
    %c0_i32_0 = arith.constant 0 : i32
    %c0_i32_1 = arith.constant 0 : i32
    %c0_i32_2 = arith.constant 0 : i32
    return %c0_i32, %c0_i32_0, %c0_i32_1 : i32, i32, i32
  }
  func.func @transform_3(%arg0: i32) -> (i32, i32) {
    %c0_i32 = arith.constant 0 : i32
    %c0_i32_0 = arith.constant 0 : i32
    %c0_i32_1 = arith.constant 0 : i32
    return %c0_i32, %c0_i32_0 : i32, i32
  }
  func.func @transform_4(%arg0: i32) -> (i32, i32, i32) {
    %c0_i32 = arith.constant 0 : i32
    %c0_i32_0 = arith.constant 0 : i32
    %c0_i32_1 = arith.constant 0 : i32
    return %arg0, %c0_i32, %c0_i32_0 : i32, i32, i32
  }
}

</mosaic_0001>

<bundles_post_ra>
// kernel: tpu_custom_call.1
= control target key start
LH: loop header
LB: loop body
LE: loop exit
PB: predicated region body
PF: predicated region fallthrough
CT: control target
= control target key end

     0   :  { %v1070_v1 = vmov 2   ;;  %v1071_v2 = vmov 1   ;;  %s1773_s0 = inlined_call_operand.vmem [shape: f32[1,16,128], index: 0, kind: input, shape index: {}]   ;;  %s1774_s1 = inlined_call_operand.vmem [shape: f32[16,12], index: 1, kind: input, shape index: {}]   ;;  %s1775_s2 = inlined_call_operand.vmem [shape: f32[3,16,11], index: 2, kind: input, shape index: {}]   ;;  %s1776_s3 = inlined_call_operand.vmem [shape: f32[32,144], index: 3, kind: input, shape index: {}]   ;;  %s1777_s4 = inlined_call_operand.hbm [shape: f32[1,32,128], index: 4, kind: output, shape index: {}]  }
   0x1   :  { %v1115_v0 = vld [vmem:[%s1774_s1] sm:$0xff]  ;;  %985 = vset.pattern.permute.xlu0 %v1070_v1  ;;  %984 = vset.pattern.permute.xlu1 %v1071_v2  ;;  %v1124_v3 = vld [vmem:[%s1774_s1 + $0x8] sm:$0xff] }
   0x2   :  { %75 = vperm.xlu0 %985, %v1115_v0   ;;  %61 = vperm.xlu1 %984, %v1115_v0  }
   0x3   :  { %9 = vsyncpa [#allocation4], 0  ;;  %v1072_v4 = vmov 0   ;;  %v1135_v5 = vld [vmem:[%s1775_s2 + $0x8] sm:$0xff]  ;;  %v1140_v6 = vld [vmem:[%s1775_s2] sm:$0xff]  ;;  %v1073_v8 = vmov 3  }
   0x4   :  { %v1148_v7 = vld [vmem:[%s1775_s2 + $0x18] sm:$0xff]  ;;  %v1155_v9 = vld [vmem:[%s1775_s2 + $0x28] sm:$0xff]  ;;  %v1166_v10 = vld [vmem:[%s1775_s2 + $0x10] sm:$0xff]  ;;  %v1074_v11 = vmov 4   ;;  %v1783_v12 = vmov 8   ;;  %v1781_v14 = vmov 9  }
   0x5   :  { %v1186_v13 = vld [vmem:[%s1775_s2 + $0x20] sm:$0xff]  ;;  %v1077_v15 = vmov 5   ;;  %v1780_v16 = vmov 7   ;;  %v1218_v18 = vld [vmem:[%s1773_s0 + $0x8] sm:$0xff]  ;;  %v1782_v21 = vmov 6   ;;  %v1080_v22 = vmov 11  }
   0x6   :  { %986 = vset.pattern.permute.xlu0 %v1072_v4  ;;  %65 = vperm.xlu1 %984, %v1124_v3   ;;  %v1213_v17 = vld [vmem:[%s1773_s0] sm:$0xff]  ;;  %v893_v20 = vmul.f32 -1.442695, %v1218_v18  ;;  %v1785_v23 = vmov 10   ;;  %v1778_v32 = vmov 0.0|0.0   ;;  %s1084_s21 = smov [#allocation3]  }
   0x7   :  { %46 = vperm.xlu0 %986, %v1115_v0   ;;  %v892_v19 = vmul.f32 -1.442695, %v1213_v17  ;;  %922 = vmatprep.subr.bf16.mxu0 %v1778_v32  ;;  %s881_s22 = sshll.u32 %s1084_s21, 4  ;;  %s882_s22 = int_to_ptr.vmem [resolvable:$true] %s881_s22 }
   0x8   :  { %949 = vmatprep.subr.bf16.mxu1 %v1778_v32  ;;  %s1046_s23 = scalar_lea.vmem %s882_s22, 512  ;;  %p1051_p1 = scmp.lt.s32.totalorder %s882_s22, %s882_s22 }
   0x9   :  { %1038 = vpow2.f32 %v892_v19  ;;  %p1047_p0 = scmp.ne.s32.totalorder %s882_s22, %s1046_s23  ;;  %p1052_p2 = scmp.lt.s32.totalorder %s1046_s23, %s1046_s23 }
   0xa   :  { %987 = vset.pattern.permute.xlu1 %v1070_v1  ;;  %1040 = vpow2.f32 %v893_v20 }
   0xb   :  { %51 = vperm.xlu0 %986, %v1124_v3   ;;  %79 = vperm.xlu1 %987, %v1124_v3   ;;  %p1053_p3 = por %p1052_p2, %p1051_p1 }
   0xd   :  { %p1054_p4 = pnand %p1053_p3, %p1047_p0 }
   0xf   :  { %245 = vperm.xlu0 %986, %v1135_v5   ;;  %988 = vset.pattern.permute.xlu1 %v1072_v4 }
  0x10   :  { %240 = vperm.xlu1 %988, %v1140_v6  }
  0x13   :  { %439 = vperm.xlu0 %986, %v1148_v7   ;;  %v1039_v24 = vpop.eup %1038 }
  0x14   :  { %989 = vset.pattern.permute.xlu1 %v1073_v8  ;;  %v1041_v25 = vpop.eup %1040  ;;  %v34_v26 = vadd.f32 1.0, %v1039_v24 }
  0x15   :  { %89 = vperm.xlu1 %989, %v1115_v0   ;;  %v35_v27 = vadd.f32 1.0, %v1041_v25 }
  0x16   :  { %1042 = vrcp.f32 %v34_v26 }
  0x17   :  { %597 = vperm.xlu0 %986, %v1155_v9   ;;  %1044 = vrcp.f32 %v35_v27 }
  0x19   :  { %93 = vperm.xlu1 %989, %v1124_v3  }
  0x1b   :  { %1001 = vset.pattern.permute.xlu0 %v1071_v2 }
  0x1c   :  { %255 = vperm.xlu0 %1001, %v1140_v6  }
  0x1d   :  { %990 = vset.pattern.permute.xlu1 %v1071_v2 }
  0x1e   :  { %259 = vperm.xlu1 %990, %v1135_v5  }
  0x20   :  { %447 = vperm.xlu0 %1001, %v1166_v10   ;;  %v1043_v28 = vpop.eup %1042 }
  0x21   :  { %v1045_v29 = vpop.eup %1044  ;;  %v40_v30 = vmul.f32 %v1043_v28, %v1213_v17 }
  0x22   :  { %991 = vset.pattern.permute.xlu1 %v1074_v11  ;;  %v41_v31 = vmul.f32 %v1045_v29, %v1218_v18 }
  0x23   :  { %103 = vperm.xlu1 %991, %v1115_v0  }
  0x24   :  { %609 = vperm.xlu0 %1001, %v1155_v9   ;;  %v923_v33 = vpack.c.bf16 %v41_v31, %v40_v30 }
  0x26   :  { %924 = vmatpush1.bf16.msra.mxu0 %v923_v33  ;;  %958 = vmatpush1.bf16.msra.mxu1 %v923_v33 }
  0x27   :  { %992 = vset.pattern.permute.xlu1 %v1070_v1  ;;  %925 = vmatprep.subr.bf16.mxu0 %v1778_v32 }
  0x28   :  { %1009 = vset.pattern.permute.xlu0 %v1783_v12  ;;  %273 = vperm.xlu1 %992, %v1140_v6  }
  0x29   :  { %159 = vperm.xlu0 %1009, %v1115_v0   ;;  %950 = vmatprep.subr.bf16.mxu1 %v1778_v32 }
  0x2c   :  { %277 = vperm.xlu1 %992, %v1135_v5  }
  0x2d   :  { %1010 = vset.pattern.permute.xlu0 %v1073_v8 }
  0x2e   :  { %291 = vperm.xlu0 %1010, %v1140_v6  }
  0x30   :  { %993 = vset.pattern.permute.xlu1 %v1073_v8 }
  0x31   :  { %295 = vperm.xlu1 %993, %v1135_v5  }
  0x32   :  { %479 = vperm.xlu0 %1010, %v1166_v10  }
  0x35   :  { %994 = vset.pattern.permute.xlu1 %v1072_v4 }
  0x36   :  { %641 = vperm.xlu0 %1010, %v1186_v13   ;;  %434 = vperm.xlu1 %994, %v1166_v10  }
  0x3a   :  { %1016 = vset.pattern.permute.xlu0 %v1781_v14  ;;  %995 = vset.pattern.permute.xlu1 %v1077_v15 }
  0x3b   :  { %177 = vperm.xlu0 %1016, %v1124_v3   ;;  %117 = vperm.xlu1 %995, %v1115_v0  }
  0x3f   :  { %1017 = vset.pattern.permute.xlu0 %v1074_v11  ;;  %121 = vperm.xlu1 %995, %v1124_v3  }
  0x40   :  { %107 = vperm.xlu0 %1017, %v1124_v3  }
  0x43   :  { %996 = vset.pattern.permute.xlu1 %v1071_v2 }
  0x44   :  { %313 = vperm.xlu0 %1017, %v1135_v5   ;;  %451 = vperm.xlu1 %996, %v1148_v7  }
  0x48   :  { %499 = vperm.xlu0 %1017, %v1148_v7   ;;  %997 = vset.pattern.permute.xlu1 %v1074_v11 }
  0x49   :  { %309 = vperm.xlu1 %997, %v1140_v6  }
  0x4c   :  { %663 = vperm.xlu0 %1017, %v1155_v9  }
  0x4d   :  { %998 = vset.pattern.permute.xlu1 %v1070_v1 }
  0x4e   :  { %463 = vperm.xlu1 %998, %v1166_v10  }
  0x50   :  { %1021 = vset.pattern.permute.xlu0 %v1780_v16 }
  0x51   :  { %367 = vperm.xlu0 %1021, %v1135_v5  }
  0x52   :  { %467 = vperm.xlu1 %998, %v1148_v7  }
  0x55   :  { %547 = vperm.xlu0 %1021, %v1148_v7  }
  0x56   :  { %999 = vset.pattern.permute.xlu1 %v1782_v21 }
  0x57   :  { %135 = vperm.xlu1 %999, %v1124_v3  }
  0x59   :  { %1026 = vset.pattern.permute.xlu0 %v1080_v22 }
  0x5a   :  { %201 = vperm.xlu0 %1026, %v1115_v0  }
  0x5b   :  { %1000 = vset.pattern.permute.xlu1 %v1072_v4 }
  0x5c   :  { %592 = vperm.xlu1 %1000, %v1186_v13  }
  0x5e   :  { %1029 = vset.pattern.permute.xlu0 %v1785_v23 }
  0x5f   :  { %421 = vperm.xlu0 %1029, %v1135_v5  }
  0x60   :  { %1002 = vset.pattern.permute.xlu1 %v1077_v15 }
  0x61   :  { %327 = vperm.xlu1 %1002, %v1140_v6  }
  0x63   :  { %1030 = vset.pattern.permute.xlu0 %v1782_v21 }
  0x64   :  { %131 = vperm.xlu0 %1030, %v1115_v0  }
  0x65   :  { %331 = vperm.xlu1 %1002, %v1135_v5  }
  0x68   :  { %345 = vperm.xlu0 %1030, %v1140_v6  }
  0x69   :  { %1003 = vset.pattern.permute.xlu1 %v1073_v8 }
  0x6a   :  { %483 = vperm.xlu1 %1003, %v1148_v7  }
  0x6c   :  { %527 = vperm.xlu0 %1030, %v1166_v10  }
  0x6e   :  { %1004 = vset.pattern.permute.xlu1 %v1071_v2 }
  0x6f   :  { %605 = vperm.xlu1 %1004, %v1186_v13  }
  0x70   :  { %695 = vperm.xlu0 %1030, %v1186_v13  }
  0x73   :  { %1005 = vset.pattern.permute.xlu1 %v1780_v16 }
  0x74   :  { %145 = vperm.xlu1 %1005, %v1115_v0   ;;  %1032 = vset.pattern.permute.xlu0 %v1781_v14 }
  0x75   :  { %399 = vperm.xlu0 %1032, %v1140_v6  }
  0x78   :  { %149 = vperm.xlu1 %1005, %v1124_v3  }
  0x79   :  { %579 = vperm.xlu0 %1032, %v1148_v7  }
  0x7c   :  { %1006 = vset.pattern.permute.xlu1 %v1782_v21 }
  0x7d   :  { %349 = vperm.xlu1 %1006, %v1135_v5   ;;  %1036 = vset.pattern.permute.xlu0 %v1783_v12 }
  0x7e   :  { %731 = vperm.xlu0 %1036, %v1186_v13  }
  0x81   :  { %v1259_v34 = vpop.permute.xlu0 %75  ;;  %1007 = vset.pattern.permute.xlu1 %v1074_v11  ;;  %v1262_v35 = vpop.permute.xlu1 %61 }
  0x82   :  { %495 = vperm.xlu1 %1007, %v1166_v10   ;;  %vm68_vm2 = vcmp.ge.f32.partialorder %v1213_v17, %v1262_v35  ;;  %vm82_vm4 = vcmp.ge.f32.partialorder %v1213_v17, %v1259_v34 }
  0x85   :  { %v1265_v36 = vpop.permute.xlu1 %65 }
  0x86   :  { %v1267_v37 = vpop.permute.xlu0 %46  ;;  %1008 = vset.pattern.permute.xlu1 %v1070_v1  ;;  %vm69_vm3 = vcmp.ge.f32.partialorder %v1218_v18, %v1265_v36 }
  0x87   :  { %623 = vperm.xlu1 %1008, %v1186_v13   ;;  %vm54_vm0 = vcmp.ge.f32.partialorder %v1213_v17, %v1267_v37 }
  0x8a   :  { %v1271_v38 = vpop.permute.xlu0 %51  ;;  %v1273_v39 = vpop.permute.xlu1 %79 }
  0x8b   :  { %627 = vperm.xlu1 %1008, %v1155_v9   ;;  %vm55_vm1 = vcmp.ge.f32.partialorder %v1218_v18, %v1271_v38  ;;  %vm83_vm5 = vcmp.ge.f32.partialorder %v1218_v18, %v1273_v39 }
  0x8e   :  { %v1276_v40 = vpop.permute.xlu0 %245 }
  0x8f   :  { %1011 = vset.pattern.permute.xlu1 %v1783_v12  ;;  %v1279_v41 = vpop.permute.xlu1 %240 }
  0x90   :  { %163 = vperm.xlu1 %1011, %v1124_v3  }
  0x92   :  { %v1282_v42 = vpop.permute.xlu0 %439 }
  0x94   :  { %1012 = vset.pattern.permute.xlu1 %v1780_v16  ;;  %v1285_v43 = vpop.permute.xlu1 %89 }
  0x95   :  { %363 = vperm.xlu1 %1012, %v1140_v6   ;;  %vm96_vm8 = vcmp.ge.f32.partialorder %v1213_v17, %v1285_v43 }
  0x96   :  { %v1288_v44 = vpop.permute.xlu0 %597 }
  0x98   :  { %v1290_v45 = vpop.permute.xlu1 %93 }
  0x99   :  { %1013 = vset.pattern.permute.xlu1 %v1077_v15  ;;  %vm97_vm6 = vcmp.ge.f32.partialorder %v1218_v18, %v1290_v45 }
  0x9a   :  { %511 = vperm.xlu1 %1013, %v1166_v10  }
  0x9b   :  { %v1294_v46 = vpop.permute.xlu0 %255 }
  0x9d   :  { %v1296_v47 = vpop.permute.xlu1 %259 }
  0x9e   :  { %515 = vperm.xlu1 %1013, %v1148_v7  }
  0x9f   :  { %v1299_v48 = vpop.permute.xlu0 %447 }
  0xa2   :  { %1014 = vset.pattern.permute.xlu1 %v1073_v8  ;;  %v1302_v49 = vpop.permute.xlu1 %103 }
  0xa3   :  { %645 = vperm.xlu1 %1014, %v1155_v9   ;;  %v1305_v50 = vpop.permute.xlu0 %609  ;;  %vm110_vm9 = vcmp.ge.f32.partialorder %v1213_v17, %v1302_v49 }
  0xa7   :  { %1015 = vset.pattern.permute.xlu1 %v1781_v14  ;;  %v1308_v51 = vpop.permute.xlu1 %273 }
  0xa8   :  { %173 = vperm.xlu1 %1015, %v1115_v0   ;;  %v1311_v52 = vpop.permute.xlu0 %159 }
  0xa9   :  { %1790 = vst [vmem:[#allocation6_spill] sm:$0xff] %v1311_v52  ;;  %v1795_v52 = vmov 10  }
  0xab   :  { %v1313_v53 = vpop.permute.xlu1 %277 }
  0xac   :  { %1018 = vset.pattern.permute.xlu1 %v1783_v12 }
  0xad   :  { %v1316_v54 = vpop.permute.xlu0 %291  ;;  %381 = vperm.xlu1 %1018, %v1140_v6  }
  0xb0   :  { %v1319_v55 = vpop.permute.xlu1 %295 }
  0xb1   :  { %v1321_v56 = vpop.permute.xlu0 %479  ;;  %385 = vperm.xlu1 %1018, %v1135_v5  }
  0xb5   :  { %1019 = vset.pattern.permute.xlu1 %v1782_v21  ;;  %v1325_v57 = vpop.permute.xlu1 %434  ;;  %v1327_v58 = vpop.permute.xlu0 %641 }
  0xb6   :  { %1791 = vst [vmem:[#allocation7_spill] sm:$0xff] %v1327_v58  ;;  %531 = vperm.xlu1 %1019, %v1148_v7  }
  0xba   :  { %1020 = vset.pattern.permute.xlu1 %v1074_v11  ;;  %v1331_v59 = vpop.permute.xlu1 %117  ;;  %v1333_v60 = vpop.permute.xlu0 %177  ;;  %v1365_v11 = vsub.f32 %v1218_v18, %v1271_v38 }
  0xbb   :  { %1792 = vst [vmem:[#allocation8_spill] sm:$0xff] %v1333_v60  ;;  %659 = vperm.xlu1 %1020, %v1186_v13   ;;  %vm124_vm10 = vcmp.ge.f32.partialorder %v1213_v17, %v1331_v59 }
  0xbc   :  { %v249_v26 = vmul.f32 %v1276_v40, %v1365_v11 }
  0xbe   :  { %v1336_v61 = vpop.permute.xlu1 %121 }
  0xbf   :  { %v1338_v62 = vpop.permute.xlu0 %107  ;;  %1022 = vset.pattern.permute.xlu1 %v1785_v23  ;;  %v1452_v23 = vsub.f32 %v1213_v17, %v1302_v49  ;;  %vm125_vm12 = vcmp.ge.f32.partialorder %v1218_v18, %v1336_v61 }
  0xc0   :  { %187 = vperm.xlu1 %1022, %v1115_v0   ;;  %v1359_v0 = vsub.f32 %v1213_v17, %v1267_v37  ;;  %vm111_vm7 = vcmp.ge.f32.partialorder %v1218_v18, %v1338_v62 }
  0xc2   :  { %v248_v27 = vmul.f32 %v1279_v41, %v1359_v0  ;;  %v1399_v41 = vsub.f32 %v1213_v17, %v1262_v35  ;;  %v1416_v35 = vsub.f32 %v1213_v17, %v1259_v34 }
  0xc3   :  { %v1342_v63 = vpop.permute.xlu0 %313  ;;  %v1344_v1 = vpop.permute.xlu1 %451 }
  0xc4   :  { %191 = vperm.xlu1 %1022, %v1124_v3  }
  0xc7   :  { %v1347_v2 = vpop.permute.xlu0 %499 }
  0xc8   :  { %1023 = vset.pattern.permute.xlu1 %v1781_v14  ;;  %v1350_v4 = vpop.permute.xlu1 %309  ;;  %v1403_v14 = vsub.f32 %v1218_v18, %v1265_v36 }
  0xc9   :  { %403 = vperm.xlu1 %1023, %v1135_v5   ;;  %v1786_v5 = vmov 0.0  }
  0xca   :  { %v894_v20 = vsel %vm54_vm0, 1.0, %v1786_v5  ;;  %v895_v24 = vsel %vm55_vm1, 1.0, %v1786_v5  ;;  %v896_v29 = vsel %vm68_vm2, 1.0, %v1786_v5  ;;  %v897_v30 = vsel %vm69_vm3, 1.0, %v1786_v5 }
  0xcb   :  { %v1353_v8 = vpop.permute.xlu0 %663  ;;  %v898_v31 = vsel %vm82_vm4, 1.0, %v1786_v5  ;;  %v214_v33 = vsub.f32 %v894_v20, %v896_v29  ;;  %v215_v37 = vsub.f32 %v895_v24, %v897_v30  ;;  %v899_v38 = vsel %vm83_vm5, 1.0, %v1786_v5 }
  0xcc   :  { %1793 = vst [vmem:[#allocation9_spill] sm:$0xff] %v1353_v8  ;;  %v217_v20 = vsub.f32 %v897_v30, %v899_v38  ;;  %v262_v24 = vmul.f32 %v1294_v46, %v1399_v41  ;;  %v263_v36 = vmul.f32 %v1296_v47, %v1403_v14  ;;  %v901_v30 = vsel %vm97_vm6, 1.0, %v1786_v5 }
  0xcd   :  { %1024 = vset.pattern.permute.xlu1 %v1780_v16  ;;  %v1368_v19 = vpop.permute.xlu1 %463  ;;  %v251_v32 = vmul.f32 %v249_v26, %v215_v37  ;;  %v250_v16 = vmul.f32 %v248_v27, %v214_v33  ;;  %v1424_v26 = vsub.f32 %v1218_v18, %v1273_v39  ;;  %v1434_v34 = vsel %vm111_vm7, 1.0, %v1786_v5 }
  0xce   :  { %543 = vperm.xlu1 %1024, %v1166_v10   ;;  %v900_v47 = vsel %vm96_vm8, 1.0, %v1786_v5  ;;  %v1439_v39 = vsub.f32 %v1213_v17, %v1285_v43  ;;  %v1448_v37 = vsub.f32 %v1218_v18, %v1290_v45  ;;  %v265_v12 = vmul.f32 %v263_v36, %v217_v20 }
  0xcf   :  { %v267_v46 = vadd.f32 %v251_v32, %v217_v20  ;;  %v281_v32 = vmul.f32 %v1313_v53, %v1424_v26  ;;  %v280_v43 = vmul.f32 %v1308_v51, %v1416_v35  ;;  %v902_v53 = vsel %vm110_vm9, 1.0, %v1786_v5 }
  0xd0   :  { %v1379_v25 = vpop.permute.xlu0 %367  ;;  %v443_v45 = vmul.f32 %v1282_v42, %v1365_v11  ;;  %v218_v20 = vsub.f32 %v898_v31, %v900_v47  ;;  %v298_v49 = vmul.f32 %v1316_v54, %v1439_v39  ;;  %v316_v36 = vmul.f32 %v1350_v4, %v1452_v23 }
  0xd1   :  { %v1387_v28 = vpop.permute.xlu1 %467  ;;  %v220_v8 = vsub.f32 %v900_v47, %v902_v53  ;;  %v454_v47 = vmul.f32 %v1299_v48, %v1399_v41  ;;  %vm774_vm0 = vcmask 130048  }
  0xd2   :  { %1025 = vset.pattern.permute.xlu1 %v1077_v15  ;;  %v216_v15 = vsub.f32 %v896_v29, %v898_v31  ;;  %v282_v42 = vmul.f32 %v280_v43, %v218_v20 }
  0xd3   :  { %677 = vperm.xlu1 %1025, %v1186_v13  }
  0xd4   :  { %v1395_v40 = vpop.permute.xlu0 %547  ;;  %v266_v27 = vadd.f32 %v250_v16, %v216_v15  ;;  %v264_v16 = vmul.f32 %v262_v24, %v216_v15  ;;  %v219_v15 = vsub.f32 %v899_v38, %v901_v30  ;;  %v221_v24 = vsub.f32 %v901_v30, %v1434_v34 }
  0xd5   :  { %v299_v38 = vmul.f32 %v1319_v55, %v1448_v37  ;;  %v442_v30 = vmul.f32 %v1325_v57, %v1359_v0  ;;  %v601_v55 = vmul.f32 %v1288_v44, %v1365_v11 }
  0xd6   :  { %v1405_v21 = vpop.permute.xlu1 %135  ;;  %v285_v60 = vadd.f32 %v265_v12, %v219_v15  ;;  %v284_v57 = vadd.f32 %v264_v16, %v218_v20 }
  0xd7   :  { %681 = vperm.xlu1 %1025, %v1155_v9   ;;  %v1473_v58 = vmul.f32 %v299_v38, %v221_v24  ;;  %vm139_vm13 = vcmp.ge.f32.partialorder %v1218_v18, %v1405_v21 }
  0xd9   :  { %v1426_v29 = vpop.permute.xlu0 %201 }
  0xda   :  { %1794 = vst [vmem:[#allocation10_spill] sm:$0xff] %v1426_v29  ;;  %v268_v29 = vsub.f32 %v266_v27, %v264_v16 }
  0xdb   :  { %1027 = vset.pattern.permute.xlu1 %v1080_v22  ;;  %v1444_v33 = vpop.permute.xlu1 %592  ;;  %v904_v22 = vsel %vm124_vm10, 1.0, %v1786_v5  ;;  %v269_v5 = vsub.f32 %v267_v46, %v265_v12  ;;  %v300_v46 = vmul.f32 %v298_v49, %v220_v8  ;;  %v471_v12 = vmul.f32 %v1387_v28, %v1424_v26 }
  0xdc   :  { %205 = vperm.xlu1 %1027, %v1124_v3   ;;  %v283_v3 = vmul.f32 %v281_v32, %v219_v15  ;;  %v222_v31 = vsub.f32 %v902_v53, %v904_v22  ;;  %v455_v32 = vmul.f32 %v1344_v1, %v1403_v14  ;;  %v286_v53 = vsub.f32 %v284_v57, %v282_v42 }
  0xdd   :  { %v445_v11 = vmul.f32 %v443_v45, %v269_v5  ;;  %v1797_v28 = vmov 8   ;;  %v470_v5 = vmul.f32 %v1368_v19, %v1416_v35 }
  0xde   :  { %v1466_v51 = vpop.permute.xlu0 %421  ;;  %v303_v4 = vadd.f32 %v283_v3, %v221_v24  ;;  %v318_v27 = vmul.f32 %v316_v36, %v222_v31  ;;  %v287_v43 = vsub.f32 %v285_v60, %v283_v3  ;;  %v320_v1 = vadd.f32 %v300_v46, %v222_v31 }
  0xdf   :  { %v1796_v60 = vmov 0.0   ;;  %v302_v24 = vadd.f32 %v282_v42, %v220_v8  ;;  %v456_v38 = vmul.f32 %v454_v47, %v286_v53 }
  0xe0   :  { %1028 = vset.pattern.permute.xlu1 %v1795_v52  ;;  %v328_v54 = vpop.permute.xlu1 %327  ;;  %v444_v52 = vmul.f32 %v442_v30, %v268_v29  ;;  %v305_v48 = vsub.f32 %v303_v4, %v1473_v58  ;;  %v457_v29 = vmul.f32 %v455_v32, %v287_v43  ;;  %v1497_v20 = vsub.f32 %v320_v1, %v318_v27 }
  0xe1   :  { %417 = vperm.xlu1 %1028, %v1140_v6   ;;  %v1488_v6 = vsub.f32 %v1213_v17, %v1331_v59  ;;  %v459_v3 = vadd.f32 %v445_v11, %v287_v43  ;;  %v486_v30 = vmul.f32 %v1321_v56, %v1439_v39  ;;  %v304_v4 = vsub.f32 %v302_v24, %v300_v46 }
  0xe2   :  { %v458_v36 = vadd.f32 %v444_v52, %v286_v53  ;;  %v1504_v45 = vmul.f32 %v471_v12, %v305_v48  ;;  %v1798_v12 = vmov 6   ;;  %v1799_v24 = vmov 9  }
  0xe3   :  { %v1484_v15 = vpop.permute.xlu0 %131  ;;  %v334_v49 = vmul.f32 %v328_v54, %v1488_v6  ;;  %v461_v31 = vsub.f32 %v459_v3, %v457_v29  ;;  %v475_v54 = vadd.f32 %v457_v29, %v305_v48  ;;  %v1515_v57 = vmul.f32 %v486_v30, %v1497_v20 }
  0xe4   :  { %vm138_vm11 = vcmp.ge.f32.partialorder %v1213_v17, %v1484_v15  ;;  %v332_v44 = vpop.permute.xlu1 %331  ;;  %v1521_v56 = vmul.f32 %v470_v5, %v304_v4  ;;  %v460_v47 = vsub.f32 %v458_v36, %v456_v38  ;;  %v474_v52 = vadd.f32 %v456_v38, %v304_v4 }
  0xe5   :  { %v1494_v16 = vsel %vm138_vm11, 1.0, %v1796_v60  ;;  %1031 = vset.pattern.permute.xlu1 %v1797_v28  ;;  %v1548_v29 = vsub.f32 %v1218_v18, %v1336_v61  ;;  %v907_v36 = vsel %vm139_vm13, 1.0, %v1796_v60 }
  0xe6   :  { %v224_v59 = vsub.f32 %v904_v22, %v1494_v16  ;;  %559 = vperm.xlu1 %1031, %v1166_v10   ;;  %v600_v22 = vmul.f32 %v1444_v33, %v1359_v0  ;;  %v613_v0 = vmul.f32 %v1305_v50, %v1403_v14  ;;  %v603_v33 = vmul.f32 %v601_v55, %v461_v31 }
  0xe7   :  { %v476_v53 = vsub.f32 %v474_v52, %v1521_v56  ;;  %v1540_v14 = vsub.f32 %v1218_v18, %v1338_v62  ;;  %v905_v62 = vsel %vm125_vm12, 1.0, %v1796_v60  ;;  %v335_v61 = vmul.f32 %v332_v44, %v1548_v29 }
  0xe8   :  { %v1508_v8 = vmul.f32 %v334_v49, %v224_v59  ;;  %v338_v42 = vadd.f32 %v318_v27, %v224_v59  ;;  %v477_v27 = vsub.f32 %v475_v54, %v1504_v45  ;;  %v602_v43 = vmul.f32 %v600_v22, %v460_v47 }
  0xe9   :  { %v1512_v32 = vpop.permute.xlu1 %483  ;;  %v317_v3 = vmul.f32 %v1342_v63, %v1540_v14  ;;  %v223_v38 = vsub.f32 %v1434_v34, %v905_v62  ;;  %v225_v30 = vsub.f32 %v905_v62, %v907_v36  ;;  %v1566_v31 = vsub.f32 %v1213_v17, %v1484_v15  ;;  %v346_v34 = vpop.permute.xlu0 %345 }
  0xea   :  { %563 = vperm.xlu1 %1031, %v1148_v7   ;;  %v1519_v19 = vsub.f32 %v338_v42, %v1508_v8  ;;  %v1532_v1 = vmul.f32 %v613_v0, %v477_v27  ;;  %v617_v11 = vadd.f32 %v603_v33, %v477_v27  ;;  %v616_v50 = vadd.f32 %v602_v43, %v476_v53 }
  0xeb   :  { %v1800_v63 = vmov 7   ;;  %v319_v44 = vmul.f32 %v317_v3, %v223_v38  ;;  %v337_v54 = vmul.f32 %v335_v61, %v225_v30  ;;  %v1801_v15 = vmov 0.0|0.0  }
  0xec   :  { %v1526_v46 = vadd.f32 %v1515_v57, %v1519_v19  ;;  %v619_v59 = vsub.f32 %v617_v11, %v1532_v1  ;;  %v1588_v0 = vsub.f32 %v1218_v18, %v1405_v21  ;;  %v352_v43 = vmul.f32 %v346_v34, %v1566_v31 }
  0xed   :  { %v339_v47 = vadd.f32 %v319_v44, %v225_v30 }
  0xee   :  { %1033 = vset.pattern.permute.xlu1 %v1798_v12  ;;  %v606_v7 = vpop.permute.xlu1 %605  ;;  %v503_v12 = vmul.f32 %v1347_v2, %v1540_v14 }
  0xef   :  { %v612_v48 = vmul.f32 %v606_v7, %v1399_v41  ;;  %699 = vperm.xlu1 %1033, %v1155_v9   ;;  %v1600_v7 = vsub.f32 %v339_v47, %v337_v54 }
  0xf1   :  { %v1544_v55 = vmul.f32 %v612_v48, %v476_v53  ;;  %v321_v53 = vadd.f32 %v1473_v58, %v223_v38 }
  0xf3   :  { %v618_v41 = vsub.f32 %v616_v50, %v1544_v55  ;;  %1034 = vset.pattern.permute.xlu1 %v1799_v24  ;;  %v1552_v49 = vpop.permute.xlu1 %145  ;;  %v323_v58 = vsub.f32 %v321_v53, %v319_v44 }
  0xf4   :  { %575 = vperm.xlu1 %1034, %v1166_v10   ;;  %vm152_vm14 = vcmp.ge.f32.partialorder %v1213_v17, %v1552_v49 }
  0xf5   :  { %v926_v5 = vpack.c.bf16 %v619_v59, %v618_v41  ;;  %v1574_v4 = vsel %vm152_vm14, 1.0, %v1796_v60  ;;  %v487_v41 = vmul.f32 %v1512_v32, %v1448_v37 }
  0xf7   :  { %927 = vmatpush1.bf16.msra.mxu0 %v926_v5  ;;  %959 = vmatpush1.bf16.msra.mxu1 %v926_v5  ;;  %v150_v42 = vpop.permute.xlu1 %149  ;;  %v489_v3 = vmul.f32 %v487_v41, %v323_v58 }
  0xf8   :  { %vm153_vm15 = vcmp.ge.f32.partialorder %v1218_v18, %v150_v42  ;;  %v1570_v10 = vsub.f32 %v1218_v18, %v150_v42  ;;  %1035 = vset.pattern.permute.xlu1 %v1800_v63  ;;  %928 = vmatprep.subr.bf16.mxu0 %v1801_v15 }
  0xf9   :  { %v1577_v22 = vsel %vm153_vm15, 1.0, %v1796_v60  ;;  %713 = vperm.xlu1 %1035, %v1186_v13   ;;  %951 = vmatprep.subr.bf16.mxu1 %v1801_v15  ;;  %v226_v13 = vsub.f32 %v1494_v16, %v1574_v4  ;;  %v1607_v16 = vmul.f32 %v503_v12, %v1600_v7 }
  0xfa   :  { %v1583_v27 = vmul.f32 %v1379_v25, %v1570_v10  ;;  %v227_v33 = vsub.f32 %v907_v36, %v1577_v22  ;;  %v1593_v52 = vmul.f32 %v1395_v40, %v1570_v10 }
  0xfb   :  { %v356_v48 = vadd.f32 %v1508_v8, %v226_v13  ;;  %v354_v50 = vmul.f32 %v352_v43, %v226_v13  ;;  %v490_v8 = vadd.f32 %v1521_v56, %v1497_v20  ;;  %v1804_v13 = vld [vmem:[#allocation6_spill] sm:$0xff] }
  0xfc   :  { %v350_v25 = vpop.permute.xlu1 %349  ;;  %v357_v11 = vadd.f32 %v337_v54, %v227_v33  ;;  %vm166_vm2 = vcmp.ge.f32.partialorder %v1213_v17, %v1804_v13 }
  0xfd   :  { %v353_v21 = vmul.f32 %v350_v25, %v1588_v0  ;;  %717 = vperm.xlu1 %1035, %v1155_v9   ;;  %v358_v36 = vsub.f32 %v356_v48, %v354_v50  ;;  %v492_v42 = vsub.f32 %v490_v8, %v1515_v57 }
  0xff   :  { %v355_v40 = vmul.f32 %v353_v21, %v227_v33  ;;  %v1803_v33 = vld [vmem:[#allocation8_spill] sm:$0xff]  ;;  %v910_v21 = vsel %vm166_vm2, 1.0, %v1796_v60 }
 0x100   :  { %vm181_vm1 = vcmp.ge.f32.partialorder %v1218_v18, %v1803_v33 }
 0x101   :  { %1037 = vset.pattern.permute.xlu1 %v1797_v28  ;;  %v496_v2 = vpop.permute.xlu1 %495  ;;  %v1612_v24 = vsub.f32 %v357_v11, %v355_v40  ;;  %v1802_v28 = vld [vmem:[#allocation7_spill] sm:$0xff]  ;;  %v1652_v12 = vsel %vm181_vm1, 1.0, %v1796_v60  ;;  %v1659_v11 = vsub.f32 %v1213_v17, %v1552_v49 }
 0x102   :  { %v502_v59 = vmul.f32 %v496_v2, %v1452_v23  ;;  %735 = vperm.xlu1 %1037, %v1155_v9   ;;  %v648_v61 = vmul.f32 %v1802_v28, %v1439_v39  ;;  %v491_v9 = vadd.f32 %v1504_v45, %v323_v58  ;;  %v753_v39 = vld [vmem:[%s1776_s3 + $0x28] sm:$0xff]  ;;  %v228_v58 = vsub.f32 %v1574_v4, %v910_v21 }
 0x103   :  { %v1620_v62 = vadd.f32 %v1607_v16, %v1612_v24  ;;  %920 = vmatprep.mubr.msk.f32.mxu1 %vm774_vm0, %v753_v39 }
 0x104   :  { %v504_v32 = vmul.f32 %v502_v59, %v1519_v19  ;;  %v493_v44 = vsub.f32 %v491_v9, %v489_v3  ;;  %v749_v19 = vld [vmem:[%s1776_s3 + $0x8] sm:$0xff]  ;;  %v374_v49 = vadd.f32 %v354_v50, %v228_v58 }
 0x105   :  { %918 = vmatprep.mubr.msk.f32.mxu0 %vm774_vm0, %v749_v19 }
 0x106   :  { %v508_v5 = vsub.f32 %v1526_v46, %v504_v32  ;;  %v522_v38 = vadd.f32 %v504_v32, %v358_v36  ;;  %v624_v30 = vpop.permute.xlu1 %623  ;;  %v635_v57 = vadd.f32 %v1532_v1, %v493_v44 }
 0x107   :  { %v630_v20 = vmul.f32 %v624_v30, %v1416_v35  ;;  %v634_v35 = vadd.f32 %v1544_v55, %v492_v42 }
 0x108   :  { %v1629_v56 = vmul.f32 %v648_v61, %v508_v5  ;;  %v528_v61 = vpop.permute.xlu0 %527 }
 0x109   :  { %v632_v63 = vmul.f32 %v630_v20, %v492_v42  ;;  %v534_v9 = vmul.f32 %v528_v61, %v1566_v31 }
 0x10a   :  { %v628_v54 = vpop.permute.xlu1 %627 }
 0x10b   :  { %v1637_v46 = vadd.f32 %v632_v63, %v508_v5  ;;  %v631_v45 = vmul.f32 %v628_v54, %v1424_v26  ;;  %v636_v43 = vsub.f32 %v634_v35, %v632_v63  ;;  %v507_v54 = vadd.f32 %v489_v3, %v1600_v7 }
 0x10d   :  { %v633_v34 = vmul.f32 %v631_v45, %v493_v44  ;;  %v654_v47 = vsub.f32 %v1637_v46, %v1629_v56 }
 0x10f   :  { %v637_v26 = vsub.f32 %v635_v57, %v633_v34  ;;  %v164_v25 = vpop.permute.xlu1 %163 }
 0x110   :  { %vm167_vm3 = vcmp.ge.f32.partialorder %v1218_v18, %v164_v25 }
 0x111   :  { %v911_v1 = vsel %vm167_vm3, 1.0, %v1796_v60  ;;  %v929_v55 = vpack.c.bf16 %v637_v26, %v636_v43  ;;  %v509_v43 = vsub.f32 %v507_v54, %v1607_v16 }
 0x112   :  { %v229_v53 = vsub.f32 %v1577_v22, %v911_v1  ;;  %v231_v48 = vsub.f32 %v911_v1, %v1652_v12 }
 0x113   :  { %930 = vmatpush1.bf16.msra.mxu0 %v929_v55  ;;  %960 = vmatpush1.bf16.msra.mxu1 %v929_v55 }
 0x114   :  { %v373_v41 = vmul.f32 %v1583_v27, %v229_v53  ;;  %v375_v2 = vadd.f32 %v355_v40, %v229_v53  ;;  %v364_v59 = vpop.permute.xlu1 %363  ;;  %931 = vmatprep.subr.bf16.mxu0 %v1801_v15  ;;  %952 = vmatprep.subr.bf16.mxu1 %v1801_v15 }
 0x115   :  { %v370_v22 = vmul.f32 %v364_v59, %v1659_v11 }
 0x116   :  { %v393_v8 = vadd.f32 %v373_v41, %v231_v48  ;;  %v377_v32 = vsub.f32 %v375_v2, %v373_v41  ;;  %v1690_v2 = vsub.f32 %v1218_v18, %v164_v25 }
 0x117   :  { %v372_v28 = vmul.f32 %v370_v22, %v228_v58 }
 0x119   :  { %v376_v5 = vsub.f32 %v374_v49, %v372_v28  ;;  %v512_v30 = vpop.permute.xlu1 %511 }
 0x11a   :  { %v518_v27 = vmul.f32 %v512_v30, %v1488_v6 }
 0x11b   :  { %v536_v20 = vmul.f32 %v534_v9, %v376_v5 }
 0x11c   :  { %v520_v40 = vmul.f32 %v518_v27, %v358_v36  ;;  %v1805_v36 = vld [vmem:[#allocation9_spill] sm:$0xff] }
 0x11d   :  { %v516_v42 = vpop.permute.xlu1 %515  ;;  %v667_v57 = vmul.f32 %v1805_v36, %v1540_v14  ;;  %v1684_v14 = vsub.f32 %v1213_v17, %v1804_v13 }
 0x11e   :  { %v538_v63 = vadd.f32 %v520_v40, %v376_v5  ;;  %v519_v44 = vmul.f32 %v516_v42, %v1548_v29  ;;  %v524_v4 = vsub.f32 %v522_v38, %v520_v40  ;;  %v653_v38 = vadd.f32 %v633_v34, %v509_v43  ;;  %v696_v42 = vpop.permute.xlu0 %695 }
 0x120   :  { %v521_v19 = vmul.f32 %v519_v44, %v1612_v24  ;;  %v1672_v50 = vsub.f32 %v538_v63, %v536_v20  ;;  %v670_v39 = vadd.f32 %v1629_v56, %v524_v4 }
 0x122   :  { %v525_v46 = vsub.f32 %v1620_v62, %v521_v19  ;;  %v539_v45 = vadd.f32 %v521_v19, %v377_v32  ;;  %v646_v35 = vpop.permute.xlu1 %645  ;;  %v1806_v19 = vld [vmem:[#allocation10_spill] sm:$0xff] }
 0x123   :  { %v649_v26 = vmul.f32 %v646_v35, %v1448_v37  ;;  %vm208_vm5 = vcmp.ge.f32.partialorder %v1213_v17, %v1806_v19 }
 0x124   :  { %v669_v7 = vmul.f32 %v667_v57, %v525_v46 }
 0x125   :  { %v651_v1 = vmul.f32 %v649_v26, %v509_v43 }
 0x127   :  { %v655_v3 = vsub.f32 %v653_v38, %v651_v1  ;;  %v671_v24 = vadd.f32 %v651_v1, %v525_v46  ;;  %v174_v55 = vpop.permute.xlu1 %173  ;;  %v400_v46 = vpop.permute.xlu0 %399 }
 0x128   :  { %vm180_vm4 = vcmp.ge.f32.partialorder %v1213_v17, %v174_v55 }
 0x129   :  { %v912_v56 = vsel %vm180_vm4, 1.0, %v1796_v60  ;;  %v932_v62 = vpack.c.bf16 %v655_v3, %v654_v47  ;;  %v673_v53 = vsub.f32 %v671_v24, %v669_v7  ;;  %v397_v3 = vsub.f32 %v1218_v18, %v1803_v33 }
 0x12a   :  { %v230_v41 = vsub.f32 %v910_v21, %v912_v56 }
 0x12b   :  { %933 = vmatpush1.bf16.msra.mxu0 %v932_v62  ;;  %961 = vmatpush1.bf16.msra.mxu1 %v932_v62 }
 0x12c   :  { %v392_v37 = vadd.f32 %v372_v28, %v230_v41  ;;  %v382_v16 = vpop.permute.xlu1 %381  ;;  %934 = vmatprep.subr.bf16.mxu0 %v1801_v15  ;;  %953 = vmatprep.subr.bf16.mxu1 %v1801_v15 }
 0x12d   :  { %v388_v34 = vmul.f32 %v382_v16, %v1684_v14 }
 0x12f   :  { %v390_v47 = vmul.f32 %v388_v34, %v230_v41 }
 0x130   :  { %v386_v59 = vpop.permute.xlu1 %385 }
 0x131   :  { %v389_v21 = vmul.f32 %v386_v59, %v1690_v2  ;;  %v394_v58 = vsub.f32 %v392_v37, %v390_v47 }
 0x133   :  { %v391_v13 = vmul.f32 %v389_v21, %v231_v48  ;;  %v554_v22 = vadd.f32 %v536_v20, %v394_v58  ;;  %v1701_v48 = vsub.f32 %v1213_v17, %v174_v55  ;;  %v916_v20 = vsel %vm208_vm5, 1.0, %v1796_v60 }
 0x135   :  { %v395_v49 = vsub.f32 %v393_v8, %v391_v13  ;;  %v532_v61 = vpop.permute.xlu1 %531 }
 0x136   :  { %v535_v28 = vmul.f32 %v532_v61, %v1588_v0 }
 0x137   :  { %v553_v5 = vmul.f32 %v1593_v52, %v395_v49 }
 0x138   :  { %v537_v30 = vmul.f32 %v535_v28, %v377_v32 }
 0x13a   :  { %v555_v9 = vadd.f32 %v537_v30, %v395_v49  ;;  %v660_v27 = vpop.permute.xlu1 %659  ;;  %v541_v40 = vsub.f32 %v539_v45, %v537_v30  ;;  %v702_v49 = vmul.f32 %v696_v42, %v1566_v31 }
 0x13b   :  { %v666_v25 = vmul.f32 %v660_v27, %v1452_v23 }
 0x13c   :  { %v1696_v63 = vsub.f32 %v555_v9, %v553_v5  ;;  %v689_v44 = vadd.f32 %v669_v7, %v541_v40 }
 0x13d   :  { %v668_v54 = vmul.f32 %v666_v25, %v524_v4  ;;  %v406_v4 = vmul.f32 %v400_v46, %v1701_v48 }
 0x13f   :  { %v672_v8 = vsub.f32 %v670_v39, %v668_v54  ;;  %v688_v52 = vadd.f32 %v668_v54, %v1672_v50  ;;  %v188_v32 = vpop.permute.xlu1 %187 }
 0x140   :  { %vm194_vm6 = vcmp.ge.f32.partialorder %v1213_v17, %v188_v32  ;;  %v414_v31 = vsub.f32 %v1213_v17, %v188_v32 }
 0x141   :  { %v914_v23 = vsel %vm194_vm6, 1.0, %v1796_v60  ;;  %v935_v45 = vpack.c.bf16 %v673_v53, %v672_v8 }
 0x142   :  { %v232_v35 = vsub.f32 %v912_v56, %v914_v23  ;;  %v234_v57 = vsub.f32 %v914_v23, %v916_v20 }
 0x143   :  { %936 = vmatpush1.bf16.msra.mxu0 %v935_v45  ;;  %962 = vmatpush1.bf16.msra.mxu1 %v935_v45  ;;  %v192_v36 = vpop.permute.xlu1 %191 }
 0x144   :  { %v408_v43 = vmul.f32 %v406_v4, %v232_v35  ;;  %v410_v39 = vadd.f32 %v390_v47, %v232_v35  ;;  %vm195_vm7 = vcmp.ge.f32.partialorder %v1218_v18, %v192_v36  ;;  %937 = vmatprep.subr.bf16.mxu0 %v1801_v15  ;;  %954 = vmatprep.subr.bf16.mxu1 %v1801_v15  ;;  %v580_v35 = vpop.permute.xlu0 %579 }
 0x145   :  { %v915_v26 = vsel %vm195_vm7, 1.0, %v1796_v60 }
 0x146   :  { %v428_v38 = vadd.f32 %v408_v43, %v234_v57  ;;  %v233_v1 = vsub.f32 %v1652_v12, %v915_v26  ;;  %v412_v7 = vsub.f32 %v410_v39, %v408_v43 }
 0x148   :  { %v411_v24 = vadd.f32 %v391_v13, %v233_v1  ;;  %v404_v55 = vpop.permute.xlu1 %403 }
 0x149   :  { %v407_v56 = vmul.f32 %v404_v55, %v397_v3 }
 0x14b   :  { %v409_v62 = vmul.f32 %v407_v56, %v233_v1 }
 0x14d   :  { %v544_v53 = vpop.permute.xlu1 %543  ;;  %v413_v41 = vsub.f32 %v411_v24, %v409_v62 }
 0x14e   :  { %v550_v37 = vmul.f32 %v544_v53, %v1659_v11 }
 0x14f   :  { %v571_v16 = vadd.f32 %v553_v5, %v413_v41 }
 0x150   :  { %v552_v34 = vmul.f32 %v550_v37, %v394_v58  ;;  %v732_v37 = vpop.permute.xlu0 %731 }
 0x152   :  { %v556_v47 = vsub.f32 %v554_v22, %v552_v34  ;;  %v570_v59 = vadd.f32 %v552_v34, %v412_v7  ;;  %v678_v21 = vpop.permute.xlu1 %677 }
 0x153   :  { %v684_v12 = vmul.f32 %v678_v21, %v1488_v6 }
 0x154   :  { %v704_v13 = vmul.f32 %v702_v49, %v556_v47 }
 0x155   :  { %v686_v61 = vmul.f32 %v684_v12, %v1672_v50  ;;  %v415_v50 = vsub.f32 %v1218_v18, %v192_v36  ;;  %v583_v36 = vmul.f32 %v580_v35, %v397_v3  ;;  %v738_v3 = vmul.f32 %v732_v37, %v1684_v14 }
 0x156   :  { %v682_v33 = vpop.permute.xlu1 %681 }
 0x157   :  { %v690_v28 = vsub.f32 %v688_v52, %v686_v61  ;;  %v706_v30 = vadd.f32 %v686_v61, %v556_v47  ;;  %v685_v9 = vmul.f32 %v682_v33, %v1548_v29  ;;  %v425_v19 = vmul.f32 %v1466_v51, %v415_v50 }
 0x159   :  { %v687_v27 = vmul.f32 %v685_v9, %v541_v40  ;;  %v708_v25 = vsub.f32 %v706_v30, %v704_v13 }
 0x15b   :  { %v691_v54 = vsub.f32 %v689_v44, %v687_v27  ;;  %v707_v58 = vadd.f32 %v687_v27, %v1696_v63  ;;  %v206_v22 = vpop.permute.xlu1 %205 }
 0x15c   :  { %vm209_vm8 = vcmp.ge.f32.partialorder %v1218_v18, %v206_v22  ;;  %v754_v22 = vld [vmem:[%s1776_s3 + $0x30] sm:$0xff] }
 0x15d   :  { %v938_v5 = vpack.c.bf16 %v691_v54, %v690_v28  ;;  %v917_v6 = vsel %vm209_vm8, 1.0, %v1796_v60  ;;  %v751_v54 = vld [vmem:[%s1776_s3 + $0x18] sm:$0xff] }
 0x15e   :  { %v235_v40 = vsub.f32 %v915_v26, %v917_v6 }
 0x15f   :  { %939 = vmatpush1.bf16.msra.mxu0 %v938_v5  ;;  %963 = vmatpush1.bf16.msra.mxu1 %v938_v5 }
 0x160   :  { %v418_v42 = vpop.permute.xlu1 %417  ;;  %940 = vmatprep.subr.bf16.mxu0 %v1801_v15  ;;  %955 = vmatprep.subr.bf16.mxu1 %v1801_v15  ;;  %v427_v20 = vmul.f32 %v425_v19, %v235_v40  ;;  %v429_v17 = vadd.f32 %v409_v62, %v235_v40 }
 0x161   :  { %v424_v29 = vmul.f32 %v418_v42, %v414_v31 }
 0x162   :  { %v431_v18 = vsub.f32 %v429_v17, %v427_v20 }
 0x163   :  { %v426_v44 = vmul.f32 %v424_v29, %v234_v57 }
 0x165   :  { %v430_v8 = vsub.f32 %v428_v38, %v426_v44  ;;  %v560_v52 = vpop.permute.xlu1 %559  ;;  %v585_v38 = vmul.f32 %v583_v36, %v431_v18 }
 0x166   :  { %v566_v60 = vmul.f32 %v560_v52, %v1684_v14 }
 0x168   :  { %v568_v32 = vmul.f32 %v566_v60, %v412_v7 }
 0x169   :  { %v564_v46 = vpop.permute.xlu1 %563 }
 0x16a   :  { %v586_v23 = vadd.f32 %v568_v32, %v430_v8  ;;  %v567_v45 = vmul.f32 %v564_v46, %v1690_v2  ;;  %v572_v4 = vsub.f32 %v570_v59, %v568_v32 }
 0x16c   :  { %v569_v43 = vmul.f32 %v567_v45, %v413_v41  ;;  %v724_v39 = vadd.f32 %v704_v13, %v572_v4 }
 0x16e   :  { %v573_v57 = vsub.f32 %v571_v16, %v569_v43  ;;  %v587_v26 = vadd.f32 %v569_v43, %v431_v18  ;;  %v700_v51 = vpop.permute.xlu1 %699 }
 0x16f   :  { %v703_v1 = vmul.f32 %v700_v51, %v1588_v0 }
 0x170   :  { %v589_v24 = vsub.f32 %v587_v26, %v585_v38 }
 0x171   :  { %v705_v55 = vmul.f32 %v703_v1, %v1696_v63 }
 0x173   :  { %v709_v7 = vsub.f32 %v707_v58, %v705_v55  ;;  %v725_v56 = vadd.f32 %v705_v55, %v573_v57  ;;  %v576_v62 = vpop.permute.xlu1 %575  ;;  %v755_v58 = vld [vmem:[%s1776_s3 + $0x38] sm:$0xff] }
 0x174   :  { %v582_v53 = vmul.f32 %v576_v62, %v1701_v48 }
 0x175   :  { %v941_v34 = vpack.c.bf16 %v709_v7, %v708_v25 }
 0x176   :  { %v584_v47 = vmul.f32 %v582_v53, %v430_v8 }
 0x177   :  { %942 = vmatpush1.bf16.msra.mxu0 %v941_v34  ;;  %964 = vmatpush1.bf16.msra.mxu1 %v941_v34 }
 0x178   :  { %v588_v41 = vsub.f32 %v586_v23, %v584_v47  ;;  %v714_v16 = vpop.permute.xlu1 %713  ;;  %943 = vmatprep.subr.bf16.mxu0 %v1801_v15  ;;  %956 = vmatprep.subr.bf16.mxu1 %v1801_v15 }
 0x179   :  { %v720_v0 = vmul.f32 %v714_v16, %v1659_v11 }
 0x17a   :  { %v740_v63 = vmul.f32 %v738_v3, %v588_v41 }
 0x17b   :  { %v722_v59 = vmul.f32 %v720_v0, %v572_v4 }
 0x17c   :  { %v718_v21 = vpop.permute.xlu1 %717 }
 0x17d   :  { %v726_v49 = vsub.f32 %v724_v39, %v722_v59  ;;  %v742_v48 = vadd.f32 %v722_v59, %v588_v41  ;;  %v721_v12 = vmul.f32 %v718_v21, %v1570_v10  ;;  %v748_v10 = vld [vmem:[%s1776_s3] sm:$0xff] }
 0x17f   :  { %v723_v61 = vmul.f32 %v721_v12, %v573_v57  ;;  %v744_v33 = vsub.f32 %v742_v48, %v740_v63 }
 0x181   :  { %v727_v13 = vsub.f32 %v725_v56, %v723_v61  ;;  %v743_v28 = vadd.f32 %v723_v61, %v589_v24  ;;  %v736_v14 = vpop.permute.xlu1 %735 }
 0x182   :  { %v739_v30 = vmul.f32 %v736_v14, %v1690_v2  ;;  %v752_v2 = vld [vmem:[%s1776_s3 + $0x20] sm:$0xff] }
 0x183   :  { %v944_v9 = vpack.c.bf16 %v727_v13, %v726_v49 }
 0x184   :  { %v741_v27 = vmul.f32 %v739_v30, %v589_v24 }
 0x185   :  { %945 = vmatpush1.bf16.msra.mxu0 %v944_v9  ;;  %965 = vmatpush1.bf16.msra.mxu1 %v944_v9 }
 0x186   :  { %v745_v25 = vsub.f32 %v743_v28, %v741_v27  ;;  %946 = vmatprep.subr.bf16.mxu0 %v1801_v15  ;;  %957 = vmatprep.subr.bf16.mxu1 %v1801_v15  ;;  %v750_v15 = vld [vmem:[%s1776_s3 + $0x10] sm:$0xff] }
 0x188   :  { %v947_v11 = vpack.c.bf16 %v745_v25, %v744_v33 }
 0x18a   :  { %948 = vmatpush1.bf16.msra.mxu0 %v947_v11  ;;  %966 = vmatpush1.bf16.msra.mxu1 %v947_v11 }
 0x18d   :  { %852 = vmatmul.mubr.f32.vlgmr.msra.gmra.mrb[0].mxu0 %v748_v10  ;;  %862 = vmatmul.mubr.f32.vlgmr.msra.gmra.mrb[0].mxu1 %v752_v2 }
 0x18e   :  { %919 = vmatprep.mubr.msk.f32.mxu0 %vm774_vm0, %v751_v54  ;;  %921 = vmatprep.mubr.msk.f32.mxu1 %vm774_vm0, %v755_v58 }
 0x191   :  { %857 = vmatmul.mubr.f32.gmra.mrb[2].mxu0 %v750_v15  ;;  %867 = vmatmul.mubr.f32.gmra.mrb[2].mxu1 %v754_v22 }
 0x260   :  { %v853_v5 = vpop.f32.mrb[0].mxu0  ;;  %v863_v31 = vpop.f32.mrb[0].mxu1 }
 0x261   :  { %872 = vst [vmem:[#allocation3] sm:$0xff] %v853_v5  ;;  %874 = vst [vmem:[#allocation3 + $0x10] sm:$0xff] %v863_v31  ;;  %v855_v6 = vpop.f32.mrb[1].mxu0  ;;  %v865_v50 = vpop.f32.mrb[1].mxu1 }
 0x264   :  { %v858_v42 = vpop.f32.mrb[2].mxu0  ;;  %v868_v29 = vpop.f32.mrb[2].mxu1 }
 0x265   :  { %873 = vst [vmem:[#allocation3 + $0x8] sm:$0xff] %v858_v42  ;;  %875 = vst [vmem:[#allocation3 + $0x18] sm:$0xff] %v868_v29  ;;  %v860_v40 = vpop.f32.mrb[3].mxu0  ;;  %v870_v44 = vpop.f32.mrb[3].mxu1 }
 0x266   :  { %1057 = shalt.err (!%p1054_p4)
}
 0x267   :  { %s1058_s25 = scalar_lea.hbm %s1777_s4, 512 }
 0x268   :  { %p1059_p5 = scmp.ne.s32.totalorder %s1777_s4, %s1058_s25  ;;  %p1062_p6 = scmp.lt.u32.totalorder %s1058_s25, %s1777_s4 }
 0x26a   :  { %p1064_p7 = pnand %p1062_p6, %p1059_p5 }
 0x26c   :  { %1067 = shalt.err (!%p1064_p7)
}
 0x26d   :  { %s1085_s2 = smov 128   ;;  %s1086_s30 = smov 8  }
 0x26e   :  { %887 = dma.vmem_to_hbm [thread:$0]  %s882_s22, 512, %s1777_s4, [#allocation4], %s1085_s2, %s1085_s2, %s1086_s30  }
 0x26f   :  { %1068 = dma.done.wait [#allocation4], 512  }
 0x270   :  { %1069 = vsyncadd [#allocation4], 4294966784 }
 0x271   :  { %891 = vsyncpa [#allocation4], 1 }

</bundles_post_ra>
